<compile_context>
chip_gen: v6e
topology: v6e:2x2x1
jax: 0.10.0
libtpu: 0.0.40
codegen_flags: <defaults>
</compile_context>

<pallas_src>
import functools

import jax
import jax.numpy as jnp
from jax import lax
from jax.experimental import pallas as pl
from jax.experimental.pallas import tpu as pltpu
import numpy as np


def _round_up(x, m):
    return (x + m - 1) // m * m


def lstm_chunk_kernel(x_ref, wih_ref, whh_ref, b_ref, h0_ref, c0_ref,
                      out_ref, hn_ref, cn_ref,
                      h_sc, c_sc, xg_sc, *, seq_len, t_chunk):
    """One (batch-block, seq-chunk) tile of the LSTM recurrence.

    x_ref  : (T, TB, Hp)     raw (embedded) inputs for this chunk (compute dtype)
    wih_ref: (Hp, 4*Hp)      W_ih^T (gate-aligned, padded; resident block)
    whh_ref: (Hp, 4*Hp)      W_hh^T (resident block)
    b_ref  : (1, 4*Hp)       b_ih + b_hh (f32, resident)
    h0/c0  : (TB, Hp)        initial state for this batch block (resident)
    out_ref: (T, TB, Hp)     per-timestep hidden states (f32, streamed)
    hn/cn  : (TB, Hp)        final state (resident; written at the true last step)
    h_sc/c_sc : (TB, Hp)     running state carried across seq chunks (VMEM scratch)
    xg_sc  : (T, TB, 4*Hp)   per-chunk precomputed input gates (VMEM scratch)
    """
    TB = h_sc.shape[0]
    Hp = h_sc.shape[1]
    s_idx = pl.program_id(1)

    @pl.when(s_idx == 0)
    def _():
        h_sc[...] = h0_ref[...]
        c_sc[...] = c0_ref[...]

    # Hoist weight loads out of the unrolled time loop (no CSE of ref loads).
    w_ih = wih_ref[...]
    w_hh = whh_ref[...]
    cdt = w_hh.dtype

    # Per-chunk input projection: one large MXU matmul, bias folded in.
    # TB is a multiple of 8, so the leading-dim reshape is layout-preserving.
    x2 = x_ref[...].reshape(t_chunk * TB, Hp)
    xg_sc[...] = (jnp.dot(x2, w_ih, preferred_element_type=jnp.float32)
                  .reshape(t_chunk, TB, 4 * Hp) + b_ref[...])

    h = h_sc[...]
    c = c_sc[...]

    last_chunk = (seq_len - 1) // t_chunk   # static Python ints
    last_t = (seq_len - 1) % t_chunk

    def sigm(v):
        # sigmoid via tanh: a single EUP transcendental instead of exp + reciprocal.
        return 0.5 * jnp.tanh(0.5 * v) + 0.5

    # Statically unrolled time loop within the chunk so the LLO scheduler can overlap
    # stores / EUP work of step t with the recurrent matmul of step t+1.
    for t in range(t_chunk):
        gates = xg_sc[t] + jnp.dot(h.astype(cdt), w_hh,
                                   preferred_element_type=jnp.float32)
        # PyTorch gate order [i, f, g, o]; each slice is a whole lane block (Hp = 128k).
        i_g = sigm(gates[:, 0 * Hp:1 * Hp])
        f_g = sigm(gates[:, 1 * Hp:2 * Hp])
        g_g = jnp.tanh(gates[:, 2 * Hp:3 * Hp])
        o_g = sigm(gates[:, 3 * Hp:4 * Hp])
        c = f_g * c + i_g * g_g
        h = o_g * jnp.tanh(c)
        out_ref[t] = h

        if t == last_t:  # static check; capture final state at the true last step
            @pl.when(s_idx == last_chunk)
            def _(h=h, c=c):
                hn_ref[...] = h
                cn_ref[...] = c

    h_sc[...] = h
    c_sc[...] = c


def _make_lstm_call(S_pad, Bp, Hp, *, seq_len, t_chunk, n_batch_blocks, compute_dtype):
    TB = Bp // n_batch_blocks
    grid = (n_batch_blocks, S_pad // t_chunk)   # (batch blocks "parallel", seq chunks "arbitrary")
    kernel = functools.partial(lstm_chunk_kernel, seq_len=seq_len, t_chunk=t_chunk)

    # Explicit VMEM budget (bytes): double-buffered streamed blocks + resident blocks
    # + scratch, with headroom; clamped to 64 MiB so it is safe on v7x as well.
    itx = jnp.dtype(compute_dtype).itemsize
    f32 = 4
    need = (
        2 * t_chunk * TB * Hp * itx            # x blocks (double-buffered)
        + 2 * t_chunk * TB * Hp * f32          # out blocks
        + 2 * 2 * Hp * 4 * Hp * itx            # W_ih^T + W_hh^T (conservatively 2x)
        + 2 * 4 * Hp * f32                     # bias
        + 8 * TB * Hp * f32                    # h0, c0, h_n, c_n (2x each)
        + 2 * TB * Hp * f32                    # h_sc, c_sc
        + t_chunk * TB * 4 * Hp * f32          # xg scratch
    )
    vmem_limit = int(min(max(2 * need + (4 << 20), 32 << 20), 64 << 20))

    # TODO(synk): mark the constant-index resident specs (W_ih^T/W_hh^T/h0/c0/h_n/c_n)
    # with pipeline_mode=pl.Buffered(1) to reclaim the second buffer copy (matters at
    # large H on v7x's 64 MiB VMEM).
    return pl.pallas_call(
        kernel,
        out_shape=(
            jax.ShapeDtypeStruct((S_pad, Bp, Hp), jnp.float32),  # per-step h (time-major)
            jax.ShapeDtypeStruct((Bp, Hp), jnp.float32),         # h_n
            jax.ShapeDtypeStruct((Bp, Hp), jnp.float32),         # c_n
        ),
        grid_spec=pltpu.PrefetchScalarGridSpec(
            num_scalar_prefetch=0,
            grid=grid,
            in_specs=[
                pl.BlockSpec((t_chunk, TB, Hp), lambda b, s: (s, b, 0)),   # X (streamed)
                pl.BlockSpec((Hp, 4 * Hp), lambda b, s: (0, 0)),           # W_ih^T (resident)
                pl.BlockSpec((Hp, 4 * Hp), lambda b, s: (0, 0)),           # W_hh^T (resident)
                pl.BlockSpec((1, 4 * Hp), lambda b, s: (0, 0)),            # bias (resident)
                pl.BlockSpec((TB, Hp), lambda b, s: (b, 0)),               # h0 (resident)
                pl.BlockSpec((TB, Hp), lambda b, s: (b, 0)),               # c0 (resident)
            ],
            out_specs=(
                pl.BlockSpec((t_chunk, TB, Hp), lambda b, s: (s, b, 0)),   # per-step h (streamed)
                pl.BlockSpec((TB, Hp), lambda b, s: (b, 0)),               # h_n (resident)
                pl.BlockSpec((TB, Hp), lambda b, s: (b, 0)),               # c_n (resident)
            ),
            scratch_shapes=[
                pltpu.VMEM((TB, Hp), jnp.float32),                 # running h
                pltpu.VMEM((TB, Hp), jnp.float32),                 # running c
                pltpu.VMEM((t_chunk, TB, 4 * Hp), jnp.float32),    # per-chunk x-gates
            ],
        ),
        compiler_params=pltpu.CompilerParams(
            dimension_semantics=("parallel", "arbitrary"),
            vmem_limit_bytes=vmem_limit,
        ),
    )


def _pad_gates_2d(w, H, Hp):
    # (H, 4H) -> (Hp, 4Hp) with each gate block placed at a multiple of Hp (lane-aligned).
    cols = [jnp.pad(w[:, k * H:(k + 1) * H], ((0, Hp - H), (0, Hp - H))) for k in range(4)]
    return jnp.concatenate(cols, axis=1)


def _pad_gates_1d(b, H, Hp):
    cols = [jnp.pad(b[k * H:(k + 1) * H], (0, Hp - H)) for k in range(4)]
    return jnp.concatenate(cols)


@functools.partial(jax.jit, static_argnames=("n_layers", "t_chunk", "compute_dtype"))
def encoder_rnn_forward(input_ids, params, n_layers=1, t_chunk=32,
                        compute_dtype=jnp.bfloat16):
    """Mirror of EncoderRNN.forward(input_, hidden=None, cell=None).

    Like the PyTorch module, n_layers > 1 re-applies the SAME single-layer LSTM and
    feeds the previous (hidden, cell) in as the next initial state.
    """
    cdt = jnp.dtype(compute_dtype)
    B, S = input_ids.shape
    H = params["embedding"].shape[1]

    Hp = _round_up(H, 128)                  # lane-dense hidden size
    # Split the batch into 2 blocks whenever possible so v7x's 2nd TC has work.
    if B > 8:
        Bp = _round_up(B, 16)
        n_bb = 2
    else:
        Bp = _round_up(B, 8)
        n_bb = 1
    t_chunk = min(t_chunk, _round_up(S, 8))
    S_pad = _round_up(S, t_chunk)

    # TODO(synk): fuse the embedding gather into the kernel via scalar-prefetch row
    # gather (pl.Element) instead of materializing (S, B, H) in HBM.
    emb_tm = params["embedding"][input_ids.T].astype(cdt)          # (S, B, H) time-major
    x = jnp.pad(emb_tm, ((0, S_pad - S), (0, Bp - B), (0, Hp - H)))  # (S_pad, Bp, Hp)

    wih_p = _pad_gates_2d(params["w_ih"].T.astype(jnp.float32), H, Hp).astype(cdt)  # (Hp, 4Hp)
    whh_p = _pad_gates_2d(params["w_hh"].T.astype(jnp.float32), H, Hp).astype(cdt)  # (Hp, 4Hp)
    bias_p = _pad_gates_1d((params["b_ih"] + params["b_hh"]).astype(jnp.float32),
                           H, Hp)[None, :]                                           # (1, 4Hp)

    h_p = jnp.zeros((Bp, Hp), jnp.float32)   # initHidden -> zeros
    c_p = jnp.zeros((Bp, Hp), jnp.float32)

    lstm = _make_lstm_call(S_pad, Bp, Hp, seq_len=S, t_chunk=t_chunk,
                           n_batch_blocks=n_bb, compute_dtype=cdt)

    # TODO(synk): for n_layers > 1, fuse the next layer's input projection as a
    # per-chunk epilogue output of the kernel to avoid re-reading out_tm from HBM.
    out_tm = None
    for layer in range(n_layers):
        xin = x if layer == 0 else out_tm.astype(cdt)
        out_tm, h_p, c_p = lstm(xin, wih_p, whh_p, bias_p, h_p, c_p)

    # TODO(synk): write the per-step output batch-major from the kernel (per-chunk
    # scratch + in-kernel transpose) to drop this final XLA transpose pass.
    output = jnp.transpose(out_tm, (1, 0, 2))[:B, :S, :H]   # (B, S, H) batch_first
    hidden = h_p[None, :B, :H]                              # (1, B, H)
    cell = c_p[None, :B, :H]                                # (1, B, H)
    return output, hidden, cell


def init_params(key, input_size, hidden_size):
    """Deterministic parameter init (shapes match nn.Embedding + nn.LSTM)."""
    k_emb, k_wih, k_whh, k_bih, k_bhh = jax.random.split(key, 5)
    H = hidden_size
    bound = 1.0 / np.sqrt(H)
    return {
        "embedding": jax.random.normal(k_emb, (input_size, H), jnp.float32),
        "w_ih": jax.random.uniform(k_wih, (4 * H, H), jnp.float32, -bound, bound),
        "w_hh": jax.random.uniform(k_whh, (4 * H, H), jnp.float32, -bound, bound),
        "b_ih": jax.random.uniform(k_bih, (4 * H,), jnp.float32, -bound, bound),
        "b_hh": jax.random.uniform(k_bhh, (4 * H,), jnp.float32, -bound, bound),
    }


def _reference_forward(input_ids, params, n_layers=1):
    """Pure-JAX f32 reference (same math as the PyTorch module, via lax.scan)."""
    emb = params["embedding"][input_ids].astype(jnp.float32)
    B, S, H = emb.shape
    wih_t, whh_t = params["w_ih"].T, params["w_hh"].T
    b = params["b_ih"] + params["b_hh"]
    x = jnp.transpose(emb, (1, 0, 2))
    h = jnp.zeros((B, H), jnp.float32)
    c = jnp.zeros((B, H), jnp.float32)

    def cell_step(carry, x_t):
        h, c = carry
        g = x_t @ wih_t + h @ whh_t + b
        i = jax.nn.sigmoid(g[:, :H]); f = jax.nn.sigmoid(g[:, H:2 * H])
        gg = jnp.tanh(g[:, 2 * H:3 * H]); o = jax.nn.sigmoid(g[:, 3 * H:])
        c2 = f * c + i * gg
        h2 = o * jnp.tanh(c2)
        return (h2, c2), h2

    out = x
    for _ in range(n_layers):
        (h, c), out = lax.scan(cell_step, (h, c), out)
    return jnp.transpose(out, (1, 0, 2)), h[None], c[None]


if __name__ == "__main__":
    key = jax.random.PRNGKey(0)
    k_ids1, k_ids2, k_params = jax.random.split(key, 3)

    input_size = 50   # vocab size
    hidden_size = 32
    params = init_params(k_params, input_size, hidden_size)

    # Case 1: batch=2, seq=8, n_layers=1 (module defaults), f32 mode -> tight check.
    ids1 = jax.random.randint(k_ids1, (2, 8), 0, input_size, dtype=jnp.int32)
    out1, h1, c1 = encoder_rnn_forward(ids1, params, n_layers=1,
                                       compute_dtype=jnp.float32)
    jax.block_until_ready((out1, h1, c1))
    r_out1, r_h1, r_c1 = _reference_forward(ids1, params, n_layers=1)
    np.testing.assert_allclose(np.asarray(out1), np.asarray(r_out1), rtol=1e-4, atol=1e-4)
    np.testing.assert_allclose(np.asarray(h1), np.asarray(r_h1), rtol=1e-4, atol=1e-4)
    np.testing.assert_allclose(np.asarray(c1), np.asarray(r_c1), rtol=1e-4, atol=1e-4)
    assert out1.shape == (2, 8, hidden_size)
    assert h1.shape == (1, 2, hidden_size)
    assert c1.shape == (1, 2, hidden_size)

    # Case 2: ragged shapes (batch=3, seq=11 -> exercises batch/seq/chunk padding and
    # final-state capture inside a padded chunk), n_layers=2, f32 mode -> tight check.
    ids2 = jax.random.randint(k_ids2, (3, 11), 0, input_size, dtype=jnp.int32)
    out2, h2, c2 = encoder_rnn_forward(ids2, params, n_layers=2,
                                       compute_dtype=jnp.float32)
    jax.block_until_ready((out2, h2, c2))
    r_out2, r_h2, r_c2 = _reference_forward(ids2, params, n_layers=2)
    np.testing.assert_allclose(np.asarray(out2), np.asarray(r_out2), rtol=1e-4, atol=1e-4)
    np.testing.assert_allclose(np.asarray(h2), np.asarray(r_h2), rtol=1e-4, atol=1e-4)
    np.testing.assert_allclose(np.asarray(c2), np.asarray(r_c2), rtol=1e-4, atol=1e-4)

    # Case 3: default bf16 streaming path (perf mode) -> loose check vs f32 reference
    # (bf16 inputs/weights, f32 accumulation and state).
    out3, h3, c3 = encoder_rnn_forward(ids2, params, n_layers=2)
    jax.block_until_ready((out3, h3, c3))
    np.testing.assert_allclose(np.asarray(out3), np.asarray(r_out2), rtol=5e-2, atol=5e-2)
    np.testing.assert_allclose(np.asarray(h3), np.asarray(r_h2), rtol=5e-2, atol=5e-2)
    np.testing.assert_allclose(np.asarray(c3), np.asarray(r_c2), rtol=5e-2, atol=5e-2)

    print("KERNEL_OK")
</pallas_src>

<mosaic_0001>
module attributes {stable_mosaic.version = 11 : i64} {
  func.func @lstm_chunk_kernel(%arg0: i32, %arg1: i32, %arg2: memref<8x8x128xf32, #tpu.memory_space<vmem>>, %arg3: memref<128x512xf32, #tpu.memory_space<vmem>>, %arg4: memref<128x512xf32, #tpu.memory_space<vmem>>, %arg5: memref<1x512xf32, #tpu.memory_space<vmem>>, %arg6: memref<8x128xf32, #tpu.memory_space<vmem>>, %arg7: memref<8x128xf32, #tpu.memory_space<vmem>>, %arg8: memref<8x8x128xf32, #tpu.memory_space<vmem>>, %arg9: memref<8x128xf32, #tpu.memory_space<vmem>>, %arg10: memref<8x128xf32, #tpu.memory_space<vmem>>, %arg11: memref<8x128xf32, #tpu.memory_space<vmem>>, %arg12: memref<8x128xf32, #tpu.memory_space<vmem>>, %arg13: memref<8x8x512xf32, #tpu.memory_space<vmem>>) attributes {dimension_semantics = [#tpu.dimension_semantics<parallel>, #tpu.dimension_semantics<arbitrary>], iteration_bounds = array<i64: 1, 1>, scalar_prefetch = 0 : i64, scratch_operands = 3 : i64, tpu.core_type = #tpu.core_type<tc>, window_params = [{transform_indices = @transform_0, window_bounds = array<i64: 8, 8, 128>}, {pipeline_mode = #tpu.pipeline_mode<synchronous>, transform_indices = @transform_1, window_bounds = array<i64: 128, 512>}, {pipeline_mode = #tpu.pipeline_mode<synchronous>, transform_indices = @transform_2, window_bounds = array<i64: 128, 512>}, {pipeline_mode = #tpu.pipeline_mode<synchronous>, transform_indices = @transform_3, window_bounds = array<i64: 1, 512>}, {transform_indices = @transform_4, window_bounds = array<i64: 8, 128>}, {transform_indices = @transform_5, window_bounds = array<i64: 8, 128>}, {transform_indices = @transform_6, window_bounds = array<i64: 8, 8, 128>}, {transform_indices = @transform_7, window_bounds = array<i64: 8, 128>}, {transform_indices = @transform_8, window_bounds = array<i64: 8, 128>}]} {
    %c0_i32 = arith.constant 0 : i32
    %0 = arith.cmpi eq, %arg1, %c0_i32 : i32
    %1 = arith.extui %0 : i1 to i32
    %c0_i32_0 = arith.constant 0 : i32
    %2 = arith.cmpi ne, %1, %c0_i32_0 : i32
    scf.if %2 {
      %c0_143 = arith.constant 0 : index
      %c0_144 = arith.constant 0 : index
      %325 = vector.load %arg6[%c0_143, %c0_144] : memref<8x128xf32, #tpu.memory_space<vmem>>, vector<8x128xf32>
      %c0_145 = arith.constant 0 : index
      %c0_146 = arith.constant 0 : index
      %326 = vector.load %arg11[%c0_145, %c0_146] : memref<8x128xf32, #tpu.memory_space<vmem>>, vector<8x128xf32>
      tpu.vector_store %arg11[%c0_145, %c0_146], %325 {strides = array<i32>} : memref<8x128xf32, #tpu.memory_space<vmem>>, vector<8x128xf32>,
      %c0_147 = arith.constant 0 : index
      %c0_148 = arith.constant 0 : index
      %327 = vector.load %arg7[%c0_147, %c0_148] : memref<8x128xf32, #tpu.memory_space<vmem>>, vector<8x128xf32>
      %c0_149 = arith.constant 0 : index
      %c0_150 = arith.constant 0 : index
      %328 = vector.load %arg12[%c0_149, %c0_150] : memref<8x128xf32, #tpu.memory_space<vmem>>, vector<8x128xf32>
      tpu.vector_store %arg12[%c0_149, %c0_150], %327 {strides = array<i32>} : memref<8x128xf32, #tpu.memory_space<vmem>>, vector<8x128xf32>,
    } else {
    }
    %c0 = arith.constant 0 : index
    %c0_1 = arith.constant 0 : index
    %3 = vector.load %arg3[%c0, %c0_1] : memref<128x512xf32, #tpu.memory_space<vmem>>, vector<128x512xf32>
    %c0_2 = arith.constant 0 : index
    %c0_3 = arith.constant 0 : index
    %4 = vector.load %arg4[%c0_2, %c0_3] : memref<128x512xf32, #tpu.memory_space<vmem>>, vector<128x512xf32>
    %c0_4 = arith.constant 0 : index
    %c0_5 = arith.constant 0 : index
    %c0_6 = arith.constant 0 : index
    %5 = vector.load %arg2[%c0_4, %c0_5, %c0_6] : memref<8x8x128xf32, #tpu.memory_space<vmem>>, vector<8x8x128xf32>
    %6 = vector.shape_cast %5 : vector<8x8x128xf32> to vector<64x128xf32>
    %cst = arith.constant dense<0.000000e+00> : vector<64x512xf32>
    %7 = tpu.matmul %6, %3, %cst {dimension_numbers = #tpu.dot_dimension_numbers<[1], [0], [0], [1], [0, 0, 1, 1], [], []>} : vector<64x128xf32>, vector<128x512xf32>, vector<64x512xf32> -> vector<64x512xf32>
    %8 = vector.shape_cast %7 : vector<64x512xf32> to vector<8x8x512xf32>
    %c0_7 = arith.constant 0 : index
    %c0_8 = arith.constant 0 : index
    %9 = vector.load %arg5[%c0_7, %c0_8] : memref<1x512xf32, #tpu.memory_space<vmem>>, vector<1x512xf32>
    %10 = vector.shape_cast %9 : vector<1x512xf32> to vector<1x1x512xf32>
    %11 = vector.broadcast %10 : vector<1x1x512xf32> to vector<8x8x512xf32>
    %12 = arith.addf %8, %11 : vector<8x8x512xf32>
    %c0_9 = arith.constant 0 : index
    %c0_10 = arith.constant 0 : index
    %c0_11 = arith.constant 0 : index
    %13 = vector.load %arg13[%c0_9, %c0_10, %c0_11] : memref<8x8x512xf32, #tpu.memory_space<vmem>>, vector<8x8x512xf32>
    tpu.vector_store %arg13[%c0_9, %c0_10, %c0_11], %12 {strides = array<i32>} : memref<8x8x512xf32, #tpu.memory_space<vmem>>, vector<8x8x512xf32>,
    %c0_12 = arith.constant 0 : index
    %c0_13 = arith.constant 0 : index
    %14 = vector.load %arg11[%c0_12, %c0_13] : memref<8x128xf32, #tpu.memory_space<vmem>>, vector<8x128xf32>
    %c0_14 = arith.constant 0 : index
    %c0_15 = arith.constant 0 : index
    %15 = vector.load %arg12[%c0_14, %c0_15] : memref<8x128xf32, #tpu.memory_space<vmem>>, vector<8x128xf32>
    %c0_16 = arith.constant 0 : index
    %c0_17 = arith.constant 0 : index
    %c0_18 = arith.constant 0 : index
    %16 = vector.load %arg13[%c0_16, %c0_17, %c0_18] : memref<8x8x512xf32, #tpu.memory_space<vmem>>, vector<1x8x512xf32>
    %17 = vector.shape_cast %16 : vector<1x8x512xf32> to vector<8x512xf32>
    %cst_19 = arith.constant dense<0.000000e+00> : vector<8x512xf32>
    %18 = tpu.matmul %14, %4, %cst_19 {dimension_numbers = #tpu.dot_dimension_numbers<[1], [0], [0], [1], [0, 0, 1, 1], [], []>} : vector<8x128xf32>, vector<128x512xf32>, vector<8x512xf32> -> vector<8x512xf32>
    %19 = arith.addf %17, %18 : vector<8x512xf32>
    %20 = vector.extract_strided_slice %19 {offsets = [0, 0], sizes = [8, 128], strides = [1, 1]} : vector<8x512xf32> to vector<8x128xf32>
    %cst_20 = arith.constant 5.000000e-01 : f32
    %21 = vector.broadcast %cst_20 : f32 to vector<8x128xf32>
    %22 = arith.mulf %21, %20 : vector<8x128xf32>
    %23 = math.tanh %22 : vector<8x128xf32>
    %cst_21 = arith.constant 5.000000e-01 : f32
    %24 = vector.broadcast %cst_21 : f32 to vector<8x128xf32>
    %25 = arith.mulf %24, %23 : vector<8x128xf32>
    %cst_22 = arith.constant 5.000000e-01 : f32
    %26 = vector.broadcast %cst_22 : f32 to vector<8x128xf32>
    %27 = arith.addf %25, %26 : vector<8x128xf32>
    %28 = vector.extract_strided_slice %19 {offsets = [0, 128], sizes = [8, 128], strides = [1, 1]} : vector<8x512xf32> to vector<8x128xf32>
    %cst_23 = arith.constant 5.000000e-01 : f32
    %29 = vector.broadcast %cst_23 : f32 to vector<8x128xf32>
    %30 = arith.mulf %29, %28 : vector<8x128xf32>
    %31 = math.tanh %30 : vector<8x128xf32>
    %cst_24 = arith.constant 5.000000e-01 : f32
    %32 = vector.broadcast %cst_24 : f32 to vector<8x128xf32>
    %33 = arith.mulf %32, %31 : vector<8x128xf32>
    %cst_25 = arith.constant 5.000000e-01 : f32
    %34 = vector.broadcast %cst_25 : f32 to vector<8x128xf32>
    %35 = arith.addf %33, %34 : vector<8x128xf32>
    %36 = vector.extract_strided_slice %19 {offsets = [0, 256], sizes = [8, 128], strides = [1, 1]} : vector<8x512xf32> to vector<8x128xf32>
    %37 = math.tanh %36 : vector<8x128xf32>
    %38 = vector.extract_strided_slice %19 {offsets = [0, 384], sizes = [8, 128], strides = [1, 1]} : vector<8x512xf32> to vector<8x128xf32>
    %cst_26 = arith.constant 5.000000e-01 : f32
    %39 = vector.broadcast %cst_26 : f32 to vector<8x128xf32>
    %40 = arith.mulf %39, %38 : vector<8x128xf32>
    %41 = math.tanh %40 : vector<8x128xf32>
    %cst_27 = arith.constant 5.000000e-01 : f32
    %42 = vector.broadcast %cst_27 : f32 to vector<8x128xf32>
    %43 = arith.mulf %42, %41 : vector<8x128xf32>
    %cst_28 = arith.constant 5.000000e-01 : f32
    %44 = vector.broadcast %cst_28 : f32 to vector<8x128xf32>
    %45 = arith.addf %43, %44 : vector<8x128xf32>
    %46 = arith.mulf %35, %15 : vector<8x128xf32>
    %47 = arith.mulf %27, %37 : vector<8x128xf32>
    %48 = arith.addf %46, %47 : vector<8x128xf32>
    %49 = math.tanh %48 : vector<8x128xf32>
    %50 = arith.mulf %45, %49 : vector<8x128xf32>
    %c0_29 = arith.constant 0 : index
    %c0_30 = arith.constant 0 : index
    %c0_31 = arith.constant 0 : index
    %51 = vector.load %arg8[%c0_29, %c0_30, %c0_31] : memref<8x8x128xf32, #tpu.memory_space<vmem>>, vector<1x8x128xf32>
    %52 = vector.shape_cast %51 : vector<1x8x128xf32> to vector<8x128xf32>
    %53 = vector.shape_cast %50 : vector<8x128xf32> to vector<1x8x128xf32>
    tpu.vector_store %arg8[%c0_29, %c0_30, %c0_31], %53 {strides = array<i32>} : memref<8x8x128xf32, #tpu.memory_space<vmem>>, vector<1x8x128xf32>,
    %c1 = arith.constant 1 : index
    %c0_32 = arith.constant 0 : index
    %c0_33 = arith.constant 0 : index
    %54 = vector.load %arg13[%c1, %c0_32, %c0_33] : memref<8x8x512xf32, #tpu.memory_space<vmem>>, vector<1x8x512xf32>
    %55 = vector.shape_cast %54 : vector<1x8x512xf32> to vector<8x512xf32>
    %cst_34 = arith.constant dense<0.000000e+00> : vector<8x512xf32>
    %56 = tpu.matmul %50, %4, %cst_34 {dimension_numbers = #tpu.dot_dimension_numbers<[1], [0], [0], [1], [0, 0, 1, 1], [], []>} : vector<8x128xf32>, vector<128x512xf32>, vector<8x512xf32> -> vector<8x512xf32>
    %57 = arith.addf %55, %56 : vector<8x512xf32>
    %58 = vector.extract_strided_slice %57 {offsets = [0, 0], sizes = [8, 128], strides = [1, 1]} : vector<8x512xf32> to vector<8x128xf32>
    %cst_35 = arith.constant 5.000000e-01 : f32
    %59 = vector.broadcast %cst_35 : f32 to vector<8x128xf32>
    %60 = arith.mulf %59, %58 : vector<8x128xf32>
    %61 = math.tanh %60 : vector<8x128xf32>
    %cst_36 = arith.constant 5.000000e-01 : f32
    %62 = vector.broadcast %cst_36 : f32 to vector<8x128xf32>
    %63 = arith.mulf %62, %61 : vector<8x128xf32>
    %cst_37 = arith.constant 5.000000e-01 : f32
    %64 = vector.broadcast %cst_37 : f32 to vector<8x128xf32>
    %65 = arith.addf %63, %64 : vector<8x128xf32>
    %66 = vector.extract_strided_slice %57 {offsets = [0, 128], sizes = [8, 128], strides = [1, 1]} : vector<8x512xf32> to vector<8x128xf32>
    %cst_38 = arith.constant 5.000000e-01 : f32
    %67 = vector.broadcast %cst_38 : f32 to vector<8x128xf32>
    %68 = arith.mulf %67, %66 : vector<8x128xf32>
    %69 = math.tanh %68 : vector<8x128xf32>
    %cst_39 = arith.constant 5.000000e-01 : f32
    %70 = vector.broadcast %cst_39 : f32 to vector<8x128xf32>
    %71 = arith.mulf %70, %69 : vector<8x128xf32>
    %cst_40 = arith.constant 5.000000e-01 : f32
    %72 = vector.broadcast %cst_40 : f32 to vector<8x128xf32>
    %73 = arith.addf %71, %72 : vector<8x128xf32>
    %74 = vector.extract_strided_slice %57 {offsets = [0, 256], sizes = [8, 128], strides = [1, 1]} : vector<8x512xf32> to vector<8x128xf32>
    %75 = math.tanh %74 : vector<8x128xf32>
    %76 = vector.extract_strided_slice %57 {offsets = [0, 384], sizes = [8, 128], strides = [1, 1]} : vector<8x512xf32> to vector<8x128xf32>
    %cst_41 = arith.constant 5.000000e-01 : f32
    %77 = vector.broadcast %cst_41 : f32 to vector<8x128xf32>
    %78 = arith.mulf %77, %76 : vector<8x128xf32>
    %79 = math.tanh %78 : vector<8x128xf32>
    %cst_42 = arith.constant 5.000000e-01 : f32
    %80 = vector.broadcast %cst_42 : f32 to vector<8x128xf32>
    %81 = arith.mulf %80, %79 : vector<8x128xf32>
    %cst_43 = arith.constant 5.000000e-01 : f32
    %82 = vector.broadcast %cst_43 : f32 to vector<8x128xf32>
    %83 = arith.addf %81, %82 : vector<8x128xf32>
    %84 = arith.mulf %73, %48 : vector<8x128xf32>
    %85 = arith.mulf %65, %75 : vector<8x128xf32>
    %86 = arith.addf %84, %85 : vector<8x128xf32>
    %87 = math.tanh %86 : vector<8x128xf32>
    %88 = arith.mulf %83, %87 : vector<8x128xf32>
    %c1_44 = arith.constant 1 : index
    %c0_45 = arith.constant 0 : index
    %c0_46 = arith.constant 0 : index
    %89 = vector.load %arg8[%c1_44, %c0_45, %c0_46] : memref<8x8x128xf32, #tpu.memory_space<vmem>>, vector<1x8x128xf32>
    %90 = vector.shape_cast %89 : vector<1x8x128xf32> to vector<8x128xf32>
    %91 = vector.shape_cast %88 : vector<8x128xf32> to vector<1x8x128xf32>
    tpu.vector_store %arg8[%c1_44, %c0_45, %c0_46], %91 {strides = array<i32>} : memref<8x8x128xf32, #tpu.memory_space<vmem>>, vector<1x8x128xf32>,
    %c2 = arith.constant 2 : index
    %c0_47 = arith.constant 0 : index
    %c0_48 = arith.constant 0 : index
    %92 = vector.load %arg13[%c2, %c0_47, %c0_48] : memref<8x8x512xf32, #tpu.memory_space<vmem>>, vector<1x8x512xf32>
    %93 = vector.shape_cast %92 : vector<1x8x512xf32> to vector<8x512xf32>
    %cst_49 = arith.constant dense<0.000000e+00> : vector<8x512xf32>
    %94 = tpu.matmul %88, %4, %cst_49 {dimension_numbers = #tpu.dot_dimension_numbers<[1], [0], [0], [1], [0, 0, 1, 1], [], []>} : vector<8x128xf32>, vector<128x512xf32>, vector<8x512xf32> -> vector<8x512xf32>
    %95 = arith.addf %93, %94 : vector<8x512xf32>
    %96 = vector.extract_strided_slice %95 {offsets = [0, 0], sizes = [8, 128], strides = [1, 1]} : vector<8x512xf32> to vector<8x128xf32>
    %cst_50 = arith.constant 5.000000e-01 : f32
    %97 = vector.broadcast %cst_50 : f32 to vector<8x128xf32>
    %98 = arith.mulf %97, %96 : vector<8x128xf32>
    %99 = math.tanh %98 : vector<8x128xf32>
    %cst_51 = arith.constant 5.000000e-01 : f32
    %100 = vector.broadcast %cst_51 : f32 to vector<8x128xf32>
    %101 = arith.mulf %100, %99 : vector<8x128xf32>
    %cst_52 = arith.constant 5.000000e-01 : f32
    %102 = vector.broadcast %cst_52 : f32 to vector<8x128xf32>
    %103 = arith.addf %101, %102 : vector<8x128xf32>
    %104 = vector.extract_strided_slice %95 {offsets = [0, 128], sizes = [8, 128], strides = [1, 1]} : vector<8x512xf32> to vector<8x128xf32>
    %cst_53 = arith.constant 5.000000e-01 : f32
    %105 = vector.broadcast %cst_53 : f32 to vector<8x128xf32>
    %106 = arith.mulf %105, %104 : vector<8x128xf32>
    %107 = math.tanh %106 : vector<8x128xf32>
    %cst_54 = arith.constant 5.000000e-01 : f32
    %108 = vector.broadcast %cst_54 : f32 to vector<8x128xf32>
    %109 = arith.mulf %108, %107 : vector<8x128xf32>
    %cst_55 = arith.constant 5.000000e-01 : f32
    %110 = vector.broadcast %cst_55 : f32 to vector<8x128xf32>
    %111 = arith.addf %109, %110 : vector<8x128xf32>
    %112 = vector.extract_strided_slice %95 {offsets = [0, 256], sizes = [8, 128], strides = [1, 1]} : vector<8x512xf32> to vector<8x128xf32>
    %113 = math.tanh %112 : vector<8x128xf32>
    %114 = vector.extract_strided_slice %95 {offsets = [0, 384], sizes = [8, 128], strides = [1, 1]} : vector<8x512xf32> to vector<8x128xf32>
    %cst_56 = arith.constant 5.000000e-01 : f32
    %115 = vector.broadcast %cst_56 : f32 to vector<8x128xf32>
    %116 = arith.mulf %115, %114 : vector<8x128xf32>
    %117 = math.tanh %116 : vector<8x128xf32>
    %cst_57 = arith.constant 5.000000e-01 : f32
    %118 = vector.broadcast %cst_57 : f32 to vector<8x128xf32>
    %119 = arith.mulf %118, %117 : vector<8x128xf32>
    %cst_58 = arith.constant 5.000000e-01 : f32
    %120 = vector.broadcast %cst_58 : f32 to vector<8x128xf32>
    %121 = arith.addf %119, %120 : vector<8x128xf32>
    %122 = arith.mulf %111, %86 : vector<8x128xf32>
    %123 = arith.mulf %103, %113 : vector<8x128xf32>
    %124 = arith.addf %122, %123 : vector<8x128xf32>
    %125 = math.tanh %124 : vector<8x128xf32>
    %126 = arith.mulf %121, %125 : vector<8x128xf32>
    %c2_59 = arith.constant 2 : index
    %c0_60 = arith.constant 0 : index
    %c0_61 = arith.constant 0 : index
    %127 = vector.load %arg8[%c2_59, %c0_60, %c0_61] : memref<8x8x128xf32, #tpu.memory_space<vmem>>, vector<1x8x128xf32>
    %128 = vector.shape_cast %127 : vector<1x8x128xf32> to vector<8x128xf32>
    %129 = vector.shape_cast %126 : vector<8x128xf32> to vector<1x8x128xf32>
    tpu.vector_store %arg8[%c2_59, %c0_60, %c0_61], %129 {strides = array<i32>} : memref<8x8x128xf32, #tpu.memory_space<vmem>>, vector<1x8x128xf32>,
    %c3 = arith.constant 3 : index
    %c0_62 = arith.constant 0 : index
    %c0_63 = arith.constant 0 : index
    %130 = vector.load %arg13[%c3, %c0_62, %c0_63] : memref<8x8x512xf32, #tpu.memory_space<vmem>>, vector<1x8x512xf32>
    %131 = vector.shape_cast %130 : vector<1x8x512xf32> to vector<8x512xf32>
    %cst_64 = arith.constant dense<0.000000e+00> : vector<8x512xf32>
    %132 = tpu.matmul %126, %4, %cst_64 {dimension_numbers = #tpu.dot_dimension_numbers<[1], [0], [0], [1], [0, 0, 1, 1], [], []>} : vector<8x128xf32>, vector<128x512xf32>, vector<8x512xf32> -> vector<8x512xf32>
    %133 = arith.addf %131, %132 : vector<8x512xf32>
    %134 = vector.extract_strided_slice %133 {offsets = [0, 0], sizes = [8, 128], strides = [1, 1]} : vector<8x512xf32> to vector<8x128xf32>
    %cst_65 = arith.constant 5.000000e-01 : f32
    %135 = vector.broadcast %cst_65 : f32 to vector<8x128xf32>
    %136 = arith.mulf %135, %134 : vector<8x128xf32>
    %137 = math.tanh %136 : vector<8x128xf32>
    %cst_66 = arith.constant 5.000000e-01 : f32
    %138 = vector.broadcast %cst_66 : f32 to vector<8x128xf32>
    %139 = arith.mulf %138, %137 : vector<8x128xf32>
    %cst_67 = arith.constant 5.000000e-01 : f32
    %140 = vector.broadcast %cst_67 : f32 to vector<8x128xf32>
    %141 = arith.addf %139, %140 : vector<8x128xf32>
    %142 = vector.extract_strided_slice %133 {offsets = [0, 128], sizes = [8, 128], strides = [1, 1]} : vector<8x512xf32> to vector<8x128xf32>
    %cst_68 = arith.constant 5.000000e-01 : f32
    %143 = vector.broadcast %cst_68 : f32 to vector<8x128xf32>
    %144 = arith.mulf %143, %142 : vector<8x128xf32>
    %145 = math.tanh %144 : vector<8x128xf32>
    %cst_69 = arith.constant 5.000000e-01 : f32
    %146 = vector.broadcast %cst_69 : f32 to vector<8x128xf32>
    %147 = arith.mulf %146, %145 : vector<8x128xf32>
    %cst_70 = arith.constant 5.000000e-01 : f32
    %148 = vector.broadcast %cst_70 : f32 to vector<8x128xf32>
    %149 = arith.addf %147, %148 : vector<8x128xf32>
    %150 = vector.extract_strided_slice %133 {offsets = [0, 256], sizes = [8, 128], strides = [1, 1]} : vector<8x512xf32> to vector<8x128xf32>
    %151 = math.tanh %150 : vector<8x128xf32>
    %152 = vector.extract_strided_slice %133 {offsets = [0, 384], sizes = [8, 128], strides = [1, 1]} : vector<8x512xf32> to vector<8x128xf32>
    %cst_71 = arith.constant 5.000000e-01 : f32
    %153 = vector.broadcast %cst_71 : f32 to vector<8x128xf32>
    %154 = arith.mulf %153, %152 : vector<8x128xf32>
    %155 = math.tanh %154 : vector<8x128xf32>
    %cst_72 = arith.constant 5.000000e-01 : f32
    %156 = vector.broadcast %cst_72 : f32 to vector<8x128xf32>
    %157 = arith.mulf %156, %155 : vector<8x128xf32>
    %cst_73 = arith.constant 5.000000e-01 : f32
    %158 = vector.broadcast %cst_73 : f32 to vector<8x128xf32>
    %159 = arith.addf %157, %158 : vector<8x128xf32>
    %160 = arith.mulf %149, %124 : vector<8x128xf32>
    %161 = arith.mulf %141, %151 : vector<8x128xf32>
    %162 = arith.addf %160, %161 : vector<8x128xf32>
    %163 = math.tanh %162 : vector<8x128xf32>
    %164 = arith.mulf %159, %163 : vector<8x128xf32>
    %c3_74 = arith.constant 3 : index
    %c0_75 = arith.constant 0 : index
    %c0_76 = arith.constant 0 : index
    %165 = vector.load %arg8[%c3_74, %c0_75, %c0_76] : memref<8x8x128xf32, #tpu.memory_space<vmem>>, vector<1x8x128xf32>
    %166 = vector.shape_cast %165 : vector<1x8x128xf32> to vector<8x128xf32>
    %167 = vector.shape_cast %164 : vector<8x128xf32> to vector<1x8x128xf32>
    tpu.vector_store %arg8[%c3_74, %c0_75, %c0_76], %167 {strides = array<i32>} : memref<8x8x128xf32, #tpu.memory_space<vmem>>, vector<1x8x128xf32>,
    %c4 = arith.constant 4 : index
    %c0_77 = arith.constant 0 : index
    %c0_78 = arith.constant 0 : index
    %168 = vector.load %arg13[%c4, %c0_77, %c0_78] : memref<8x8x512xf32, #tpu.memory_space<vmem>>, vector<1x8x512xf32>
    %169 = vector.shape_cast %168 : vector<1x8x512xf32> to vector<8x512xf32>
    %cst_79 = arith.constant dense<0.000000e+00> : vector<8x512xf32>
    %170 = tpu.matmul %164, %4, %cst_79 {dimension_numbers = #tpu.dot_dimension_numbers<[1], [0], [0], [1], [0, 0, 1, 1], [], []>} : vector<8x128xf32>, vector<128x512xf32>, vector<8x512xf32> -> vector<8x512xf32>
    %171 = arith.addf %169, %170 : vector<8x512xf32>
    %172 = vector.extract_strided_slice %171 {offsets = [0, 0], sizes = [8, 128], strides = [1, 1]} : vector<8x512xf32> to vector<8x128xf32>
    %cst_80 = arith.constant 5.000000e-01 : f32
    %173 = vector.broadcast %cst_80 : f32 to vector<8x128xf32>
    %174 = arith.mulf %173, %172 : vector<8x128xf32>
    %175 = math.tanh %174 : vector<8x128xf32>
    %cst_81 = arith.constant 5.000000e-01 : f32
    %176 = vector.broadcast %cst_81 : f32 to vector<8x128xf32>
    %177 = arith.mulf %176, %175 : vector<8x128xf32>
    %cst_82 = arith.constant 5.000000e-01 : f32
    %178 = vector.broadcast %cst_82 : f32 to vector<8x128xf32>
    %179 = arith.addf %177, %178 : vector<8x128xf32>
    %180 = vector.extract_strided_slice %171 {offsets = [0, 128], sizes = [8, 128], strides = [1, 1]} : vector<8x512xf32> to vector<8x128xf32>
    %cst_83 = arith.constant 5.000000e-01 : f32
    %181 = vector.broadcast %cst_83 : f32 to vector<8x128xf32>
    %182 = arith.mulf %181, %180 : vector<8x128xf32>
    %183 = math.tanh %182 : vector<8x128xf32>
    %cst_84 = arith.constant 5.000000e-01 : f32
    %184 = vector.broadcast %cst_84 : f32 to vector<8x128xf32>
    %185 = arith.mulf %184, %183 : vector<8x128xf32>
    %cst_85 = arith.constant 5.000000e-01 : f32
    %186 = vector.broadcast %cst_85 : f32 to vector<8x128xf32>
    %187 = arith.addf %185, %186 : vector<8x128xf32>
    %188 = vector.extract_strided_slice %171 {offsets = [0, 256], sizes = [8, 128], strides = [1, 1]} : vector<8x512xf32> to vector<8x128xf32>
    %189 = math.tanh %188 : vector<8x128xf32>
    %190 = vector.extract_strided_slice %171 {offsets = [0, 384], sizes = [8, 128], strides = [1, 1]} : vector<8x512xf32> to vector<8x128xf32>
    %cst_86 = arith.constant 5.000000e-01 : f32
    %191 = vector.broadcast %cst_86 : f32 to vector<8x128xf32>
    %192 = arith.mulf %191, %190 : vector<8x128xf32>
    %193 = math.tanh %192 : vector<8x128xf32>
    %cst_87 = arith.constant 5.000000e-01 : f32
    %194 = vector.broadcast %cst_87 : f32 to vector<8x128xf32>
    %195 = arith.mulf %194, %193 : vector<8x128xf32>
    %cst_88 = arith.constant 5.000000e-01 : f32
    %196 = vector.broadcast %cst_88 : f32 to vector<8x128xf32>
    %197 = arith.addf %195, %196 : vector<8x128xf32>
    %198 = arith.mulf %187, %162 : vector<8x128xf32>
    %199 = arith.mulf %179, %189 : vector<8x128xf32>
    %200 = arith.addf %198, %199 : vector<8x128xf32>
    %201 = math.tanh %200 : vector<8x128xf32>
    %202 = arith.mulf %197, %201 : vector<8x128xf32>
    %c4_89 = arith.constant 4 : index
    %c0_90 = arith.constant 0 : index
    %c0_91 = arith.constant 0 : index
    %203 = vector.load %arg8[%c4_89, %c0_90, %c0_91] : memref<8x8x128xf32, #tpu.memory_space<vmem>>, vector<1x8x128xf32>
    %204 = vector.shape_cast %203 : vector<1x8x128xf32> to vector<8x128xf32>
    %205 = vector.shape_cast %202 : vector<8x128xf32> to vector<1x8x128xf32>
    tpu.vector_store %arg8[%c4_89, %c0_90, %c0_91], %205 {strides = array<i32>} : memref<8x8x128xf32, #tpu.memory_space<vmem>>, vector<1x8x128xf32>,
    %c5 = arith.constant 5 : index
    %c0_92 = arith.constant 0 : index
    %c0_93 = arith.constant 0 : index
    %206 = vector.load %arg13[%c5, %c0_92, %c0_93] : memref<8x8x512xf32, #tpu.memory_space<vmem>>, vector<1x8x512xf32>
    %207 = vector.shape_cast %206 : vector<1x8x512xf32> to vector<8x512xf32>
    %cst_94 = arith.constant dense<0.000000e+00> : vector<8x512xf32>
    %208 = tpu.matmul %202, %4, %cst_94 {dimension_numbers = #tpu.dot_dimension_numbers<[1], [0], [0], [1], [0, 0, 1, 1], [], []>} : vector<8x128xf32>, vector<128x512xf32>, vector<8x512xf32> -> vector<8x512xf32>
    %209 = arith.addf %207, %208 : vector<8x512xf32>
    %210 = vector.extract_strided_slice %209 {offsets = [0, 0], sizes = [8, 128], strides = [1, 1]} : vector<8x512xf32> to vector<8x128xf32>
    %cst_95 = arith.constant 5.000000e-01 : f32
    %211 = vector.broadcast %cst_95 : f32 to vector<8x128xf32>
    %212 = arith.mulf %211, %210 : vector<8x128xf32>
    %213 = math.tanh %212 : vector<8x128xf32>
    %cst_96 = arith.constant 5.000000e-01 : f32
    %214 = vector.broadcast %cst_96 : f32 to vector<8x128xf32>
    %215 = arith.mulf %214, %213 : vector<8x128xf32>
    %cst_97 = arith.constant 5.000000e-01 : f32
    %216 = vector.broadcast %cst_97 : f32 to vector<8x128xf32>
    %217 = arith.addf %215, %216 : vector<8x128xf32>
    %218 = vector.extract_strided_slice %209 {offsets = [0, 128], sizes = [8, 128], strides = [1, 1]} : vector<8x512xf32> to vector<8x128xf32>
    %cst_98 = arith.constant 5.000000e-01 : f32
    %219 = vector.broadcast %cst_98 : f32 to vector<8x128xf32>
    %220 = arith.mulf %219, %218 : vector<8x128xf32>
    %221 = math.tanh %220 : vector<8x128xf32>
    %cst_99 = arith.constant 5.000000e-01 : f32
    %222 = vector.broadcast %cst_99 : f32 to vector<8x128xf32>
    %223 = arith.mulf %222, %221 : vector<8x128xf32>
    %cst_100 = arith.constant 5.000000e-01 : f32
    %224 = vector.broadcast %cst_100 : f32 to vector<8x128xf32>
    %225 = arith.addf %223, %224 : vector<8x128xf32>
    %226 = vector.extract_strided_slice %209 {offsets = [0, 256], sizes = [8, 128], strides = [1, 1]} : vector<8x512xf32> to vector<8x128xf32>
    %227 = math.tanh %226 : vector<8x128xf32>
    %228 = vector.extract_strided_slice %209 {offsets = [0, 384], sizes = [8, 128], strides = [1, 1]} : vector<8x512xf32> to vector<8x128xf32>
    %cst_101 = arith.constant 5.000000e-01 : f32
    %229 = vector.broadcast %cst_101 : f32 to vector<8x128xf32>
    %230 = arith.mulf %229, %228 : vector<8x128xf32>
    %231 = math.tanh %230 : vector<8x128xf32>
    %cst_102 = arith.constant 5.000000e-01 : f32
    %232 = vector.broadcast %cst_102 : f32 to vector<8x128xf32>
    %233 = arith.mulf %232, %231 : vector<8x128xf32>
    %cst_103 = arith.constant 5.000000e-01 : f32
    %234 = vector.broadcast %cst_103 : f32 to vector<8x128xf32>
    %235 = arith.addf %233, %234 : vector<8x128xf32>
    %236 = arith.mulf %225, %200 : vector<8x128xf32>
    %237 = arith.mulf %217, %227 : vector<8x128xf32>
    %238 = arith.addf %236, %237 : vector<8x128xf32>
    %239 = math.tanh %238 : vector<8x128xf32>
    %240 = arith.mulf %235, %239 : vector<8x128xf32>
    %c5_104 = arith.constant 5 : index
    %c0_105 = arith.constant 0 : index
    %c0_106 = arith.constant 0 : index
    %241 = vector.load %arg8[%c5_104, %c0_105, %c0_106] : memref<8x8x128xf32, #tpu.memory_space<vmem>>, vector<1x8x128xf32>
    %242 = vector.shape_cast %241 : vector<1x8x128xf32> to vector<8x128xf32>
    %243 = vector.shape_cast %240 : vector<8x128xf32> to vector<1x8x128xf32>
    tpu.vector_store %arg8[%c5_104, %c0_105, %c0_106], %243 {strides = array<i32>} : memref<8x8x128xf32, #tpu.memory_space<vmem>>, vector<1x8x128xf32>,
    %c6 = arith.constant 6 : index
    %c0_107 = arith.constant 0 : index
    %c0_108 = arith.constant 0 : index
    %244 = vector.load %arg13[%c6, %c0_107, %c0_108] : memref<8x8x512xf32, #tpu.memory_space<vmem>>, vector<1x8x512xf32>
    %245 = vector.shape_cast %244 : vector<1x8x512xf32> to vector<8x512xf32>
    %cst_109 = arith.constant dense<0.000000e+00> : vector<8x512xf32>
    %246 = tpu.matmul %240, %4, %cst_109 {dimension_numbers = #tpu.dot_dimension_numbers<[1], [0], [0], [1], [0, 0, 1, 1], [], []>} : vector<8x128xf32>, vector<128x512xf32>, vector<8x512xf32> -> vector<8x512xf32>
    %247 = arith.addf %245, %246 : vector<8x512xf32>
    %248 = vector.extract_strided_slice %247 {offsets = [0, 0], sizes = [8, 128], strides = [1, 1]} : vector<8x512xf32> to vector<8x128xf32>
    %cst_110 = arith.constant 5.000000e-01 : f32
    %249 = vector.broadcast %cst_110 : f32 to vector<8x128xf32>
    %250 = arith.mulf %249, %248 : vector<8x128xf32>
    %251 = math.tanh %250 : vector<8x128xf32>
    %cst_111 = arith.constant 5.000000e-01 : f32
    %252 = vector.broadcast %cst_111 : f32 to vector<8x128xf32>
    %253 = arith.mulf %252, %251 : vector<8x128xf32>
    %cst_112 = arith.constant 5.000000e-01 : f32
    %254 = vector.broadcast %cst_112 : f32 to vector<8x128xf32>
    %255 = arith.addf %253, %254 : vector<8x128xf32>
    %256 = vector.extract_strided_slice %247 {offsets = [0, 128], sizes = [8, 128], strides = [1, 1]} : vector<8x512xf32> to vector<8x128xf32>
    %cst_113 = arith.constant 5.000000e-01 : f32
    %257 = vector.broadcast %cst_113 : f32 to vector<8x128xf32>
    %258 = arith.mulf %257, %256 : vector<8x128xf32>
    %259 = math.tanh %258 : vector<8x128xf32>
    %cst_114 = arith.constant 5.000000e-01 : f32
    %260 = vector.broadcast %cst_114 : f32 to vector<8x128xf32>
    %261 = arith.mulf %260, %259 : vector<8x128xf32>
    %cst_115 = arith.constant 5.000000e-01 : f32
    %262 = vector.broadcast %cst_115 : f32 to vector<8x128xf32>
    %263 = arith.addf %261, %262 : vector<8x128xf32>
    %264 = vector.extract_strided_slice %247 {offsets = [0, 256], sizes = [8, 128], strides = [1, 1]} : vector<8x512xf32> to vector<8x128xf32>
    %265 = math.tanh %264 : vector<8x128xf32>
    %266 = vector.extract_strided_slice %247 {offsets = [0, 384], sizes = [8, 128], strides = [1, 1]} : vector<8x512xf32> to vector<8x128xf32>
    %cst_116 = arith.constant 5.000000e-01 : f32
    %267 = vector.broadcast %cst_116 : f32 to vector<8x128xf32>
    %268 = arith.mulf %267, %266 : vector<8x128xf32>
    %269 = math.tanh %268 : vector<8x128xf32>
    %cst_117 = arith.constant 5.000000e-01 : f32
    %270 = vector.broadcast %cst_117 : f32 to vector<8x128xf32>
    %271 = arith.mulf %270, %269 : vector<8x128xf32>
    %cst_118 = arith.constant 5.000000e-01 : f32
    %272 = vector.broadcast %cst_118 : f32 to vector<8x128xf32>
    %273 = arith.addf %271, %272 : vector<8x128xf32>
    %274 = arith.mulf %263, %238 : vector<8x128xf32>
    %275 = arith.mulf %255, %265 : vector<8x128xf32>
    %276 = arith.addf %274, %275 : vector<8x128xf32>
    %277 = math.tanh %276 : vector<8x128xf32>
    %278 = arith.mulf %273, %277 : vector<8x128xf32>
    %c6_119 = arith.constant 6 : index
    %c0_120 = arith.constant 0 : index
    %c0_121 = arith.constant 0 : index
    %279 = vector.load %arg8[%c6_119, %c0_120, %c0_121] : memref<8x8x128xf32, #tpu.memory_space<vmem>>, vector<1x8x128xf32>
    %280 = vector.shape_cast %279 : vector<1x8x128xf32> to vector<8x128xf32>
    %281 = vector.shape_cast %278 : vector<8x128xf32> to vector<1x8x128xf32>
    tpu.vector_store %arg8[%c6_119, %c0_120, %c0_121], %281 {strides = array<i32>} : memref<8x8x128xf32, #tpu.memory_space<vmem>>, vector<1x8x128xf32>,
    %c7 = arith.constant 7 : index
    %c0_122 = arith.constant 0 : index
    %c0_123 = arith.constant 0 : index
    %282 = vector.load %arg13[%c7, %c0_122, %c0_123] : memref<8x8x512xf32, #tpu.memory_space<vmem>>, vector<1x8x512xf32>
    %283 = vector.shape_cast %282 : vector<1x8x512xf32> to vector<8x512xf32>
    %cst_124 = arith.constant dense<0.000000e+00> : vector<8x512xf32>
    %284 = tpu.matmul %278, %4, %cst_124 {dimension_numbers = #tpu.dot_dimension_numbers<[1], [0], [0], [1], [0, 0, 1, 1], [], []>} : vector<8x128xf32>, vector<128x512xf32>, vector<8x512xf32> -> vector<8x512xf32>
    %285 = arith.addf %283, %284 : vector<8x512xf32>
    %286 = vector.extract_strided_slice %285 {offsets = [0, 0], sizes = [8, 128], strides = [1, 1]} : vector<8x512xf32> to vector<8x128xf32>
    %cst_125 = arith.constant 5.000000e-01 : f32
    %287 = vector.broadcast %cst_125 : f32 to vector<8x128xf32>
    %288 = arith.mulf %287, %286 : vector<8x128xf32>
    %289 = math.tanh %288 : vector<8x128xf32>
    %cst_126 = arith.constant 5.000000e-01 : f32
    %290 = vector.broadcast %cst_126 : f32 to vector<8x128xf32>
    %291 = arith.mulf %290, %289 : vector<8x128xf32>
    %cst_127 = arith.constant 5.000000e-01 : f32
    %292 = vector.broadcast %cst_127 : f32 to vector<8x128xf32>
    %293 = arith.addf %291, %292 : vector<8x128xf32>
    %294 = vector.extract_strided_slice %285 {offsets = [0, 128], sizes = [8, 128], strides = [1, 1]} : vector<8x512xf32> to vector<8x128xf32>
    %cst_128 = arith.constant 5.000000e-01 : f32
    %295 = vector.broadcast %cst_128 : f32 to vector<8x128xf32>
    %296 = arith.mulf %295, %294 : vector<8x128xf32>
    %297 = math.tanh %296 : vector<8x128xf32>
    %cst_129 = arith.constant 5.000000e-01 : f32
    %298 = vector.broadcast %cst_129 : f32 to vector<8x128xf32>
    %299 = arith.mulf %298, %297 : vector<8x128xf32>
    %cst_130 = arith.constant 5.000000e-01 : f32
    %300 = vector.broadcast %cst_130 : f32 to vector<8x128xf32>
    %301 = arith.addf %299, %300 : vector<8x128xf32>
    %302 = vector.extract_strided_slice %285 {offsets = [0, 256], sizes = [8, 128], strides = [1, 1]} : vector<8x512xf32> to vector<8x128xf32>
    %303 = math.tanh %302 : vector<8x128xf32>
    %304 = vector.extract_strided_slice %285 {offsets = [0, 384], sizes = [8, 128], strides = [1, 1]} : vector<8x512xf32> to vector<8x128xf32>
    %cst_131 = arith.constant 5.000000e-01 : f32
    %305 = vector.broadcast %cst_131 : f32 to vector<8x128xf32>
    %306 = arith.mulf %305, %304 : vector<8x128xf32>
    %307 = math.tanh %306 : vector<8x128xf32>
    %cst_132 = arith.constant 5.000000e-01 : f32
    %308 = vector.broadcast %cst_132 : f32 to vector<8x128xf32>
    %309 = arith.mulf %308, %307 : vector<8x128xf32>
    %cst_133 = arith.constant 5.000000e-01 : f32
    %310 = vector.broadcast %cst_133 : f32 to vector<8x128xf32>
    %311 = arith.addf %309, %310 : vector<8x128xf32>
    %312 = arith.mulf %301, %276 : vector<8x128xf32>
    %313 = arith.mulf %293, %303 : vector<8x128xf32>
    %314 = arith.addf %312, %313 : vector<8x128xf32>
    %315 = math.tanh %314 : vector<8x128xf32>
    %316 = arith.mulf %311, %315 : vector<8x128xf32>
    %c7_134 = arith.constant 7 : index
    %c0_135 = arith.constant 0 : index
    %c0_136 = arith.constant 0 : index
    %317 = vector.load %arg8[%c7_134, %c0_135, %c0_136] : memref<8x8x128xf32, #tpu.memory_space<vmem>>, vector<1x8x128xf32>
    %318 = vector.shape_cast %317 : vector<1x8x128xf32> to vector<8x128xf32>
    %319 = vector.shape_cast %316 : vector<8x128xf32> to vector<1x8x128xf32>
    tpu.vector_store %arg8[%c7_134, %c0_135, %c0_136], %319 {strides = array<i32>} : memref<8x8x128xf32, #tpu.memory_space<vmem>>, vector<1x8x128xf32>,
    %c0_i32_137 = arith.constant 0 : i32
    %320 = arith.cmpi eq, %arg1, %c0_i32_137 : i32
    %321 = arith.extui %320 : i1 to i32
    %c0_i32_138 = arith.constant 0 : i32
    %322 = arith.cmpi ne, %321, %c0_i32_138 : i32
    scf.if %322 {
      %c0_143 = arith.constant 0 : index
      %c0_144 = arith.constant 0 : index
      %325 = vector.load %arg9[%c0_143, %c0_144] : memref<8x128xf32, #tpu.memory_space<vmem>>, vector<8x128xf32>
      tpu.vector_store %arg9[%c0_143, %c0_144], %316 {strides = array<i32>} : memref<8x128xf32, #tpu.memory_space<vmem>>, vector<8x128xf32>,
      %c0_145 = arith.constant 0 : index
      %c0_146 = arith.constant 0 : index
      %326 = vector.load %arg10[%c0_145, %c0_146] : memref<8x128xf32, #tpu.memory_space<vmem>>, vector<8x128xf32>
      tpu.vector_store %arg10[%c0_145, %c0_146], %314 {strides = array<i32>} : memref<8x128xf32, #tpu.memory_space<vmem>>, vector<8x128xf32>,
    } else {
    }
    %c0_139 = arith.constant 0 : index
    %c0_140 = arith.constant 0 : index
    %323 = vector.load %arg11[%c0_139, %c0_140] : memref<8x128xf32, #tpu.memory_space<vmem>>, vector<8x128xf32>
    tpu.vector_store %arg11[%c0_139, %c0_140], %316 {strides = array<i32>} : memref<8x128xf32, #tpu.memory_space<vmem>>, vector<8x128xf32>,
    %c0_141 = arith.constant 0 : index
    %c0_142 = arith.constant 0 : index
    %324 = vector.load %arg12[%c0_141, %c0_142] : memref<8x128xf32, #tpu.memory_space<vmem>>, vector<8x128xf32>
    tpu.vector_store %arg12[%c0_141, %c0_142], %314 {strides = array<i32>} : memref<8x128xf32, #tpu.memory_space<vmem>>, vector<8x128xf32>,
    return
  }
  func.func @transform_0(%arg0: i32, %arg1: i32) -> (i32, i32, i32) {
    %c0_i32 = arith.constant 0 : i32
    %c0_i32_0 = arith.constant 0 : i32
    return %arg1, %arg0, %c0_i32 : i32, i32, i32
  }
  func.func @transform_1(%arg0: i32, %arg1: i32) -> (i32, i32) {
    %c0_i32 = arith.constant 0 : i32
    %c0_i32_0 = arith.constant 0 : i32
    %c0_i32_1 = arith.constant 0 : i32
    return %c0_i32, %c0_i32_0 : i32, i32
  }
  func.func @transform_2(%arg0: i32, %arg1: i32) -> (i32, i32) {
    %c0_i32 = arith.constant 0 : i32
    %c0_i32_0 = arith.constant 0 : i32
    %c0_i32_1 = arith.constant 0 : i32
    return %c0_i32, %c0_i32_0 : i32, i32
  }
  func.func @transform_3(%arg0: i32, %arg1: i32) -> (i32, i32) {
    %c0_i32 = arith.constant 0 : i32
    %c0_i32_0 = arith.constant 0 : i32
    %c0_i32_1 = arith.constant 0 : i32
    return %c0_i32, %c0_i32_0 : i32, i32
  }
  func.func @transform_4(%arg0: i32, %arg1: i32) -> (i32, i32) {
    %c0_i32 = arith.constant 0 : i32
    %c0_i32_0 = arith.constant 0 : i32
    return %arg0, %c0_i32 : i32, i32
  }
  func.func @transform_5(%arg0: i32, %arg1: i32) -> (i32, i32) {
    %c0_i32 = arith.constant 0 : i32
    %c0_i32_0 = arith.constant 0 : i32
    return %arg0, %c0_i32 : i32, i32
  }
  func.func @transform_6(%arg0: i32, %arg1: i32) -> (i32, i32, i32) {
    %c0_i32 = arith.constant 0 : i32
    %c0_i32_0 = arith.constant 0 : i32
    return %arg1, %arg0, %c0_i32 : i32, i32, i32
  }
  func.func @transform_7(%arg0: i32, %arg1: i32) -> (i32, i32) {
    %c0_i32 = arith.constant 0 : i32
    %c0_i32_0 = arith.constant 0 : i32
    return %arg0, %c0_i32 : i32, i32
  }
  func.func @transform_8(%arg0: i32, %arg1: i32) -> (i32, i32) {
    %c0_i32 = arith.constant 0 : i32
    %c0_i32_0 = arith.constant 0 : i32
    return %arg0, %c0_i32 : i32, i32
  }
}

</mosaic_0001>

<bundles_post_ra>
// kernel: encoder_rnn_forward.1
= control target key start
LH: loop header
LB: loop body
LE: loop exit
PB: predicated region body
PF: predicated region fallthrough
CT: control target
= control target key end

     0   :  { %v3655_v3 = vmov 0.0   ;;  %s3646_s1 = inlined_call_operand.vmem [shape: f32[128,512], index: 1, kind: input, shape index: {}]   ;;  %s3647_s0 = inlined_call_operand.vmem [shape: f32[8,8,128], index: 0, kind: input, shape index: {}]   ;;  %s3648_s2 = inlined_call_operand.vmem [shape: f32[128,512], index: 2, kind: input, shape index: {}]   ;;  %s3649_s4 = inlined_call_operand.vmem [shape: f32[8,128], index: 4, kind: input, shape index: {}, may-alias: {4,5}]   ;;  %s3650_s3 = inlined_call_operand.vmem [shape: f32[1,512], index: 3, kind: input, shape index: {}]   ;;  %s3651_s5 = inlined_call_operand.vmem [shape: f32[8,128], index: 5, kind: input, shape index: {}, may-alias: {4,5}]   ;;  %s3652_s6 = inlined_call_operand.vmem [shape: f32[8,8,128], index: 6, kind: output, shape index: {0}]   ;;  %s3653_s8 = inlined_call_operand.vmem [shape: f32[8,128], index: 8, kind: output, shape index: {2}]   ;;  %s3654_s7 = inlined_call_operand.vmem [shape: f32[8,128], index: 7, kind: output, shape index: {1}]  }
   0x1   :  { %v95_v0 = vld [vmem:[%s3646_s1 + $0x1e8] sm:$0xff]  ;;  %v97_v1 = vld [vmem:[%s3646_s1 + $0x1f8] sm:$0xff]  ;;  %v94_v2 = vld [vmem:[%s3646_s1 + $0x1e0] sm:$0xff]  ;;  %234 = vmatprep.mubr.f32.mxu0 %v3655_v3  ;;  %347 = vmatprep.mubr.f32.mxu1 %v3655_v3 }
   0x2   :  { %170 = vmatprep.subr.mxu0 %v95_v0  ;;  %283 = vmatprep.subr.mxu1 %v97_v1  ;;  %v96_v4 = vld [vmem:[%s3646_s1 + $0x1f0] sm:$0xff]  ;;  %v91_v5 = vld [vmem:[%s3646_s1 + $0x1c8] sm:$0xff]  ;;  %v93_v6 = vld [vmem:[%s3646_s1 + $0x1d8] sm:$0xff] }
   0x3   :  { %171 = vmatpush1.msra.mxu0 %v94_v2  ;;  %284 = vmatpush1.msra.mxu1 %v96_v4  ;;  %v90_v7 = vld [vmem:[%s3646_s1 + $0x1c0] sm:$0xff]  ;;  %v92_v8 = vld [vmem:[%s3646_s1 + $0x1d0] sm:$0xff]  ;;  %v87_v9 = vld [vmem:[%s3646_s1 + $0x1a8] sm:$0xff] }
   0x4   :  { %172 = vmatprep.subr.mxu0 %v91_v5  ;;  %285 = vmatprep.subr.mxu1 %v93_v6  ;;  %v89_v10 = vld [vmem:[%s3646_s1 + $0x1b8] sm:$0xff]  ;;  %v86_v11 = vld [vmem:[%s3646_s1 + $0x1a0] sm:$0xff]  ;;  %v88_v12 = vld [vmem:[%s3646_s1 + $0x1b0] sm:$0xff] }
   0x5   :  { %173 = vmatpush1.msra.mxu0 %v90_v7  ;;  %286 = vmatpush1.msra.mxu1 %v92_v8  ;;  %v83_v13 = vld [vmem:[%s3646_s1 + $0x188] sm:$0xff]  ;;  %v85_v14 = vld [vmem:[%s3646_s1 + $0x198] sm:$0xff]  ;;  %v82_v15 = vld [vmem:[%s3646_s1 + $0x180] sm:$0xff] }
   0x6   :  { %174 = vmatprep.subr.mxu0 %v87_v9  ;;  %287 = vmatprep.subr.mxu1 %v89_v10  ;;  %v84_v16 = vld [vmem:[%s3646_s1 + $0x190] sm:$0xff]  ;;  %v79_v17 = vld [vmem:[%s3646_s1 + $0x168] sm:$0xff]  ;;  %v81_v18 = vld [vmem:[%s3646_s1 + $0x178] sm:$0xff] }
   0x7   :  { %175 = vmatpush1.msra.mxu0 %v86_v11  ;;  %288 = vmatpush1.msra.mxu1 %v88_v12  ;;  %v78_v19 = vld [vmem:[%s3646_s1 + $0x160] sm:$0xff]  ;;  %v80_v20 = vld [vmem:[%s3646_s1 + $0x170] sm:$0xff]  ;;  %v75_v21 = vld [vmem:[%s3646_s1 + $0x148] sm:$0xff] }
   0x8   :  { %176 = vmatprep.subr.mxu0 %v83_v13  ;;  %289 = vmatprep.subr.mxu1 %v85_v14  ;;  %v77_v22 = vld [vmem:[%s3646_s1 + $0x158] sm:$0xff]  ;;  %v74_v23 = vld [vmem:[%s3646_s1 + $0x140] sm:$0xff]  ;;  %v76_v24 = vld [vmem:[%s3646_s1 + $0x150] sm:$0xff] }
   0x9   :  { %177 = vmatpush1.msra.mxu0 %v82_v15  ;;  %290 = vmatpush1.msra.mxu1 %v84_v16  ;;  %v71_v25 = vld [vmem:[%s3646_s1 + $0x128] sm:$0xff]  ;;  %v73_v26 = vld [vmem:[%s3646_s1 + $0x138] sm:$0xff]  ;;  %v70_v27 = vld [vmem:[%s3646_s1 + $0x120] sm:$0xff] }
   0xa   :  { %178 = vmatprep.subr.mxu0 %v79_v17  ;;  %291 = vmatprep.subr.mxu1 %v81_v18  ;;  %v72_v28 = vld [vmem:[%s3646_s1 + $0x130] sm:$0xff]  ;;  %v67_v29 = vld [vmem:[%s3646_s1 + $0x108] sm:$0xff]  ;;  %v69_v30 = vld [vmem:[%s3646_s1 + $0x118] sm:$0xff] }
   0xb   :  { %179 = vmatpush1.msra.mxu0 %v78_v19  ;;  %292 = vmatpush1.msra.mxu1 %v80_v20  ;;  %v66_v31 = vld [vmem:[%s3646_s1 + $0x100] sm:$0xff]  ;;  %v68_v32 = vld [vmem:[%s3646_s1 + $0x110] sm:$0xff]  ;;  %v63_v33 = vld [vmem:[%s3646_s1 + $0xe8] sm:$0xff] }
   0xc   :  { %180 = vmatprep.subr.mxu0 %v75_v21  ;;  %293 = vmatprep.subr.mxu1 %v77_v22  ;;  %v65_v34 = vld [vmem:[%s3646_s1 + $0xf8] sm:$0xff]  ;;  %v62_v35 = vld [vmem:[%s3646_s1 + $0xe0] sm:$0xff]  ;;  %v64_v36 = vld [vmem:[%s3646_s1 + $0xf0] sm:$0xff] }
   0xd   :  { %181 = vmatpush1.msra.mxu0 %v74_v23  ;;  %294 = vmatpush1.msra.mxu1 %v76_v24  ;;  %v59_v37 = vld [vmem:[%s3646_s1 + $0xc8] sm:$0xff]  ;;  %v61_v38 = vld [vmem:[%s3646_s1 + $0xd8] sm:$0xff]  ;;  %v58_v39 = vld [vmem:[%s3646_s1 + $0xc0] sm:$0xff] }
   0xe   :  { %182 = vmatprep.subr.mxu0 %v71_v25  ;;  %295 = vmatprep.subr.mxu1 %v73_v26  ;;  %v60_v40 = vld [vmem:[%s3646_s1 + $0xd0] sm:$0xff]  ;;  %v55_v41 = vld [vmem:[%s3646_s1 + $0xa8] sm:$0xff]  ;;  %v57_v42 = vld [vmem:[%s3646_s1 + $0xb8] sm:$0xff] }
   0xf   :  { %183 = vmatpush1.msra.mxu0 %v70_v27  ;;  %296 = vmatpush1.msra.mxu1 %v72_v28  ;;  %v54_v43 = vld [vmem:[%s3646_s1 + $0xa0] sm:$0xff]  ;;  %v56_v44 = vld [vmem:[%s3646_s1 + $0xb0] sm:$0xff]  ;;  %v51_v45 = vld [vmem:[%s3646_s1 + $0x88] sm:$0xff] }
  0x10   :  { %184 = vmatprep.subr.mxu0 %v67_v29  ;;  %297 = vmatprep.subr.mxu1 %v69_v30  ;;  %v53_v46 = vld [vmem:[%s3646_s1 + $0x98] sm:$0xff]  ;;  %v50_v47 = vld [vmem:[%s3646_s1 + $0x80] sm:$0xff]  ;;  %v52_v48 = vld [vmem:[%s3646_s1 + $0x90] sm:$0xff] }
  0x11   :  { %185 = vmatpush1.msra.mxu0 %v66_v31  ;;  %298 = vmatpush1.msra.mxu1 %v68_v32  ;;  %v47_v49 = vld [vmem:[%s3646_s1 + $0x68] sm:$0xff]  ;;  %v49_v50 = vld [vmem:[%s3646_s1 + $0x78] sm:$0xff]  ;;  %v46_v51 = vld [vmem:[%s3646_s1 + $0x60] sm:$0xff] }
  0x12   :  { %186 = vmatprep.subr.mxu0 %v63_v33  ;;  %299 = vmatprep.subr.mxu1 %v65_v34  ;;  %v48_v52 = vld [vmem:[%s3646_s1 + $0x70] sm:$0xff]  ;;  %v43_v53 = vld [vmem:[%s3646_s1 + $0x48] sm:$0xff]  ;;  %v45_v54 = vld [vmem:[%s3646_s1 + $0x58] sm:$0xff] }
  0x13   :  { %187 = vmatpush1.msra.mxu0 %v62_v35  ;;  %300 = vmatpush1.msra.mxu1 %v64_v36  ;;  %v42_v55 = vld [vmem:[%s3646_s1 + $0x40] sm:$0xff]  ;;  %v44_v56 = vld [vmem:[%s3646_s1 + $0x50] sm:$0xff]  ;;  %v39_v57 = vld [vmem:[%s3646_s1 + $0x28] sm:$0xff] }
  0x14   :  { %188 = vmatprep.subr.mxu0 %v59_v37  ;;  %301 = vmatprep.subr.mxu1 %v61_v38  ;;  %v41_v58 = vld [vmem:[%s3646_s1 + $0x38] sm:$0xff]  ;;  %v38_v59 = vld [vmem:[%s3646_s1 + $0x20] sm:$0xff]  ;;  %v40_v60 = vld [vmem:[%s3646_s1 + $0x30] sm:$0xff] }
  0x15   :  { %189 = vmatpush1.msra.mxu0 %v58_v39  ;;  %302 = vmatpush1.msra.mxu1 %v60_v40  ;;  %v35_v61 = vld [vmem:[%s3646_s1 + $0x8] sm:$0xff]  ;;  %v37_v62 = vld [vmem:[%s3646_s1 + $0x18] sm:$0xff]  ;;  %v34_v63 = vld [vmem:[%s3646_s1] sm:$0xff] }
  0x16   :  { %190 = vmatprep.subr.mxu0 %v55_v41  ;;  %303 = vmatprep.subr.mxu1 %v57_v42  ;;  %v36_v0 = vld [vmem:[%s3646_s1 + $0x10] sm:$0xff]  ;;  %v162_v1 = vld [vmem:[%s3647_s0] sm:$0xff]  ;;  %v2267_v2 = vld [vmem:[%s3648_s2 + $0x1e8] sm:$0xff] }
  0x17   :  { %191 = vmatpush1.msra.mxu0 %v54_v43  ;;  %304 = vmatpush1.msra.mxu1 %v56_v44  ;;  %3747 = vst [vmem:[#allocation5_spill] sm:$0xff] %v2267_v2  ;;  %v2272_v4 = vld [vmem:[%s3648_s2 + $0x1f8] sm:$0xff]  ;;  %v2277_v5 = vld [vmem:[%s3648_s2 + $0x1e0] sm:$0xff]  ;;  %v2282_v6 = vld [vmem:[%s3648_s2 + $0x1f0] sm:$0xff] }
  0x18   :  { %192 = vmatprep.subr.mxu0 %v51_v45  ;;  %305 = vmatprep.subr.mxu1 %v53_v46  ;;  %3748 = vst [vmem:[#allocation6_spill] sm:$0xff] %v2272_v4  ;;  %v2287_v7 = vld [vmem:[%s3648_s2 + $0x1c8] sm:$0xff]  ;;  %v2292_v8 = vld [vmem:[%s3648_s2 + $0x1d8] sm:$0xff]  ;;  %v2301_v9 = vld [vmem:[%s3648_s2 + $0x1c0] sm:$0xff] }
  0x19   :  { %193 = vmatpush1.msra.mxu0 %v50_v47  ;;  %306 = vmatpush1.msra.mxu1 %v52_v48  ;;  %v2306_v10 = vld [vmem:[%s3648_s2 + $0x1d0] sm:$0xff]  ;;  %v163_v11 = vld [vmem:[%s3647_s0 + $0x8] sm:$0xff]  ;;  %v2323_v13 = vld [vmem:[%s3648_s2 + $0x1b8] sm:$0xff] }
  0x1a   :  { %194 = vmatprep.subr.mxu0 %v47_v49  ;;  %307 = vmatprep.subr.mxu1 %v49_v50  ;;  %v2318_v12 = vld [vmem:[%s3648_s2 + $0x1a8] sm:$0xff]  ;;  %v2330_v14 = vld [vmem:[%s3648_s2 + $0x1a0] sm:$0xff]  ;;  %v2335_v15 = vld [vmem:[%s3648_s2 + $0x1b0] sm:$0xff] }
  0x1b   :  { %195 = vmatpush1.msra.mxu0 %v46_v51  ;;  %308 = vmatpush1.msra.mxu1 %v48_v52  ;;  %v2340_v16 = vld [vmem:[%s3648_s2 + $0x188] sm:$0xff]  ;;  %v2345_v17 = vld [vmem:[%s3648_s2 + $0x198] sm:$0xff]  ;;  %v2354_v18 = vld [vmem:[%s3648_s2 + $0x180] sm:$0xff] }
  0x1c   :  { %196 = vmatprep.subr.mxu0 %v43_v53  ;;  %309 = vmatprep.subr.mxu1 %v45_v54  ;;  %v2359_v19 = vld [vmem:[%s3648_s2 + $0x190] sm:$0xff]  ;;  %v2371_v21 = vld [vmem:[%s3648_s2 + $0x168] sm:$0xff]  ;;  %v2376_v22 = vld [vmem:[%s3648_s2 + $0x178] sm:$0xff] }
  0x1d   :  { %197 = vmatpush1.msra.mxu0 %v42_v55  ;;  %310 = vmatpush1.msra.mxu1 %v44_v56  ;;  %v164_v20 = vld [vmem:[%s3647_s0 + $0x10] sm:$0xff]  ;;  %v2383_v23 = vld [vmem:[%s3648_s2 + $0x160] sm:$0xff]  ;;  %v2393_v25 = vld [vmem:[%s3648_s2 + $0x148] sm:$0xff] }
  0x1e   :  { %198 = vmatprep.subr.mxu0 %v39_v57  ;;  %311 = vmatprep.subr.mxu1 %v41_v58  ;;  %v2388_v24 = vld [vmem:[%s3648_s2 + $0x170] sm:$0xff]  ;;  %v2398_v26 = vld [vmem:[%s3648_s2 + $0x158] sm:$0xff]  ;;  %v2407_v27 = vld [vmem:[%s3648_s2 + $0x140] sm:$0xff] }
  0x1f   :  { %199 = vmatpush1.msra.mxu0 %v38_v59  ;;  %312 = vmatpush1.msra.mxu1 %v40_v60  ;;  %v2412_v28 = vld [vmem:[%s3648_s2 + $0x150] sm:$0xff]  ;;  %v165_v29 = vld [vmem:[%s3647_s0 + $0x18] sm:$0xff]  ;;  %v2424_v30 = vld [vmem:[%s3648_s2 + $0x128] sm:$0xff] }
  0x20   :  { %200 = vmatprep.subr.mxu0 %v35_v61  ;;  %313 = vmatprep.subr.mxu1 %v37_v62  ;;  %v2429_v31 = vld [vmem:[%s3648_s2 + $0x138] sm:$0xff]  ;;  %v2436_v32 = vld [vmem:[%s3648_s2 + $0x120] sm:$0xff]  ;;  %v2441_v33 = vld [vmem:[%s3648_s2 + $0x130] sm:$0xff] }
  0x21   :  { %201 = vmatpush1.msra.mxu0 %v34_v63  ;;  %314 = vmatpush1.msra.mxu1 %v36_v0  ;;  %v2446_v34 = vld [vmem:[%s3648_s2 + $0x108] sm:$0xff]  ;;  %v2451_v35 = vld [vmem:[%s3648_s2 + $0x118] sm:$0xff]  ;;  %v2460_v36 = vld [vmem:[%s3648_s2 + $0x100] sm:$0xff] }
  0x22   :  { %235 = vmatmul.mubr.f32.vlgmr.msra.gmra.mxu0 %v162_v1  ;;  %348 = vmatmul.mubr.f32.vlgmr.msra.gmra.mxu1 %v162_v1  ;;  %v2465_v37 = vld [vmem:[%s3648_s2 + $0x110] sm:$0xff]  ;;  %v166_v38 = vld [vmem:[%s3647_s0 + $0x20] sm:$0xff]  ;;  %v2477_v39 = vld [vmem:[%s3648_s2 + $0xe8] sm:$0xff] }
  0x23   :  { %488 = vmatprep.subr.mxu0 %v2267_v2  ;;  %559 = vmatprep.subr.mxu1 %v2272_v4  ;;  %v2482_v40 = vld [vmem:[%s3648_s2 + $0xf8] sm:$0xff]  ;;  %v2489_v41 = vld [vmem:[%s3648_s2 + $0xe0] sm:$0xff]  ;;  %v2494_v42 = vld [vmem:[%s3648_s2 + $0xf0] sm:$0xff] }
  0x24   :  { %489 = vmatpush1.msra.mxu0 %v2277_v5  ;;  %560 = vmatpush1.msra.mxu1 %v2282_v6  ;;  %v2499_v43 = vld [vmem:[%s3648_s2 + $0xc8] sm:$0xff]  ;;  %v2504_v44 = vld [vmem:[%s3648_s2 + $0xd8] sm:$0xff]  ;;  %v2513_v45 = vld [vmem:[%s3648_s2 + $0xc0] sm:$0xff] }
  0x25   :  { %490 = vmatprep.subr.mxu0 %v2287_v7  ;;  %561 = vmatprep.subr.mxu1 %v2292_v8  ;;  %v2518_v46 = vld [vmem:[%s3648_s2 + $0xd0] sm:$0xff]  ;;  %v167_v47 = vld [vmem:[%s3647_s0 + $0x28] sm:$0xff]  ;;  %v2535_v49 = vld [vmem:[%s3648_s2 + $0xb8] sm:$0xff] }
  0x26   :  { %240 = vmatprep.mubr.f32.mxu0 %v3655_v3  ;;  %353 = vmatprep.mubr.f32.mxu1 %v3655_v3  ;;  %v2530_v48 = vld [vmem:[%s3648_s2 + $0xa8] sm:$0xff]  ;;  %v2542_v50 = vld [vmem:[%s3648_s2 + $0xa0] sm:$0xff]  ;;  %v2547_v51 = vld [vmem:[%s3648_s2 + $0xb0] sm:$0xff] }
  0x27   :  { %491 = vmatpush1.msra.mxu0 %v2301_v9  ;;  %562 = vmatpush1.msra.mxu1 %v2306_v10  ;;  %v2552_v52 = vld [vmem:[%s3648_s2 + $0x88] sm:$0xff]  ;;  %v2557_v53 = vld [vmem:[%s3648_s2 + $0x98] sm:$0xff]  ;;  %v2566_v54 = vld [vmem:[%s3648_s2 + $0x80] sm:$0xff] }
  0x28   :  { %241 = vmatmul.mubr.f32.gmra.mxu0 %v163_v11  ;;  %354 = vmatmul.mubr.f32.gmra.mxu1 %v163_v11  ;;  %3749 = vst [vmem:[#allocation7_spill] sm:$0xff] %v2552_v52  ;;  %3750 = vst [vmem:[#allocation8_spill] sm:$0xff] %v2557_v53  ;;  %v2571_v55 = vld [vmem:[%s3648_s2 + $0x90] sm:$0xff]  ;;  %v2583_v57 = vld [vmem:[%s3648_s2 + $0x68] sm:$0xff] }
  0x29   :  { %492 = vmatprep.subr.mxu0 %v2318_v12  ;;  %563 = vmatprep.subr.mxu1 %v2323_v13  ;;  %3751 = vst [vmem:[#allocation9_spill] sm:$0xff] %v2566_v54  ;;  %3752 = vst [vmem:[#allocation10_spill] sm:$0xff] %v2571_v55  ;;  %v168_v56 = vld [vmem:[%s3647_s0 + $0x30] sm:$0xff]  ;;  %v2588_v58 = vld [vmem:[%s3648_s2 + $0x78] sm:$0xff] }
  0x2a   :  { %493 = vmatpush1.msra.mxu0 %v2330_v14  ;;  %564 = vmatpush1.msra.mxu1 %v2335_v15  ;;  %3753 = vst [vmem:[#allocation11_spill] sm:$0xff] %v2583_v57  ;;  %3754 = vst [vmem:[#allocation12_spill] sm:$0xff] %v2588_v58  ;;  %v2595_v59 = vld [vmem:[%s3648_s2 + $0x60] sm:$0xff]  ;;  %v2600_v60 = vld [vmem:[%s3648_s2 + $0x70] sm:$0xff] }
  0x2b   :  { %494 = vmatprep.subr.mxu0 %v2340_v16  ;;  %565 = vmatprep.subr.mxu1 %v2345_v17  ;;  %3755 = vst [vmem:[#allocation13_spill] sm:$0xff] %v2595_v59  ;;  %3756 = vst [vmem:[#allocation14_spill] sm:$0xff] %v2600_v60  ;;  %v2605_v61 = vld [vmem:[%s3648_s2 + $0x48] sm:$0xff]  ;;  %v2610_v62 = vld [vmem:[%s3648_s2 + $0x58] sm:$0xff] }
  0x2c   :  { %246 = vmatprep.mubr.f32.mxu0 %v3655_v3  ;;  %359 = vmatprep.mubr.f32.mxu1 %v3655_v3  ;;  %3757 = vst [vmem:[#allocation15_spill] sm:$0xff] %v2605_v61  ;;  %3758 = vst [vmem:[#allocation16_spill] sm:$0xff] %v2610_v62  ;;  %v2619_v63 = vld [vmem:[%s3648_s2 + $0x40] sm:$0xff]  ;;  %v2624_v0 = vld [vmem:[%s3648_s2 + $0x50] sm:$0xff] }
  0x2d   :  { %495 = vmatpush1.msra.mxu0 %v2354_v18  ;;  %566 = vmatpush1.msra.mxu1 %v2359_v19  ;;  %3759 = vst [vmem:[#allocation17_spill] sm:$0xff] %v2619_v63  ;;  %3760 = vst [vmem:[#allocation18_spill] sm:$0xff] %v2624_v0  ;;  %v169_v1 = vld [vmem:[%s3647_s0 + $0x38] sm:$0xff]  ;;  %v2636_v11 = vld [vmem:[%s3648_s2 + $0x28] sm:$0xff] }
  0x2e   :  { %247 = vmatmul.mubr.f32.gmra.mxu0 %v164_v20  ;;  %360 = vmatmul.mubr.f32.gmra.mxu1 %v164_v20  ;;  %3761 = vst [vmem:[#allocation19_spill] sm:$0xff] %v2636_v11  ;;  %v2641_v20 = vld [vmem:[%s3648_s2 + $0x38] sm:$0xff] }
  0x2f   :  { %496 = vmatprep.subr.mxu0 %v2371_v21  ;;  %567 = vmatprep.subr.mxu1 %v2376_v22  ;;  %3762 = vst [vmem:[#allocation20_spill] sm:$0xff] %v2641_v20 }
  0x30   :  { %497 = vmatpush1.msra.mxu0 %v2383_v23  ;;  %568 = vmatpush1.msra.mxu1 %v2388_v24 }
  0x31   :  { %498 = vmatprep.subr.mxu0 %v2393_v25  ;;  %569 = vmatprep.subr.mxu1 %v2398_v26 }
  0x32   :  { %252 = vmatprep.mubr.f32.mxu0 %v3655_v3  ;;  %365 = vmatprep.mubr.f32.mxu1 %v3655_v3 }
  0x33   :  { %499 = vmatpush1.msra.mxu0 %v2407_v27  ;;  %570 = vmatpush1.msra.mxu1 %v2412_v28 }
  0x34   :  { %253 = vmatmul.mubr.f32.gmra.mxu0 %v165_v29  ;;  %366 = vmatmul.mubr.f32.gmra.mxu1 %v165_v29  ;;  %v2648_v29 = vld [vmem:[%s3648_s2 + $0x20] sm:$0xff] }
  0x35   :  { %500 = vmatprep.subr.mxu0 %v2424_v30  ;;  %571 = vmatprep.subr.mxu1 %v2429_v31  ;;  %3763 = vst [vmem:[#allocation21_spill] sm:$0xff] %v2648_v29 }
  0x36   :  { %501 = vmatpush1.msra.mxu0 %v2436_v32  ;;  %572 = vmatpush1.msra.mxu1 %v2441_v33 }
  0x37   :  { %502 = vmatprep.subr.mxu0 %v2446_v34  ;;  %573 = vmatprep.subr.mxu1 %v2451_v35 }
  0x38   :  { %258 = vmatprep.mubr.f32.mxu0 %v3655_v3  ;;  %371 = vmatprep.mubr.f32.mxu1 %v3655_v3 }
  0x39   :  { %503 = vmatpush1.msra.mxu0 %v2460_v36  ;;  %574 = vmatpush1.msra.mxu1 %v2465_v37 }
  0x3a   :  { %259 = vmatmul.mubr.f32.gmra.mxu0 %v166_v38  ;;  %372 = vmatmul.mubr.f32.gmra.mxu1 %v166_v38  ;;  %v2653_v38 = vld [vmem:[%s3648_s2 + $0x30] sm:$0xff] }
  0x3b   :  { %504 = vmatprep.subr.mxu0 %v2477_v39  ;;  %575 = vmatprep.subr.mxu1 %v2482_v40  ;;  %3764 = vst [vmem:[#allocation22_spill] sm:$0xff] %v2653_v38 }
  0x3c   :  { %505 = vmatpush1.msra.mxu0 %v2489_v41  ;;  %576 = vmatpush1.msra.mxu1 %v2494_v42 }
  0x3d   :  { %506 = vmatprep.subr.mxu0 %v2499_v43  ;;  %577 = vmatprep.subr.mxu1 %v2504_v44 }
  0x3e   :  { %264 = vmatprep.mubr.f32.mxu0 %v3655_v3  ;;  %377 = vmatprep.mubr.f32.mxu1 %v3655_v3 }
  0x3f   :  { %507 = vmatpush1.msra.mxu0 %v2513_v45  ;;  %578 = vmatpush1.msra.mxu1 %v2518_v46 }
  0x40   :  { %265 = vmatmul.mubr.f32.gmra.mxu0 %v167_v47  ;;  %378 = vmatmul.mubr.f32.gmra.mxu1 %v167_v47  ;;  %v2658_v47 = vld [vmem:[%s3648_s2 + $0x8] sm:$0xff] }
  0x41   :  { %508 = vmatprep.subr.mxu0 %v2530_v48  ;;  %579 = vmatprep.subr.mxu1 %v2535_v49  ;;  %3765 = vst [vmem:[#allocation23_spill] sm:$0xff] %v2658_v47 }
  0x42   :  { %509 = vmatpush1.msra.mxu0 %v2542_v50  ;;  %580 = vmatpush1.msra.mxu1 %v2547_v51 }
  0x43   :  { %510 = vmatprep.subr.mxu0 %v2552_v52  ;;  %581 = vmatprep.subr.mxu1 %v2557_v53 }
  0x44   :  { %270 = vmatprep.mubr.f32.mxu0 %v3655_v3  ;;  %383 = vmatprep.mubr.f32.mxu1 %v3655_v3 }
  0x45   :  { %511 = vmatpush1.msra.mxu0 %v2566_v54  ;;  %582 = vmatpush1.msra.mxu1 %v2571_v55 }
  0x46   :  { %271 = vmatmul.mubr.f32.gmra.mxu0 %v168_v56  ;;  %384 = vmatmul.mubr.f32.gmra.mxu1 %v168_v56  ;;  %v2663_v56 = vld [vmem:[%s3648_s2 + $0x18] sm:$0xff] }
  0x47   :  { %512 = vmatprep.subr.mxu0 %v2583_v57  ;;  %583 = vmatprep.subr.mxu1 %v2588_v58  ;;  %3766 = vst [vmem:[#allocation24_spill] sm:$0xff] %v2663_v56 }
  0x48   :  { %513 = vmatpush1.msra.mxu0 %v2595_v59  ;;  %584 = vmatpush1.msra.mxu1 %v2600_v60 }
  0x49   :  { %514 = vmatprep.subr.mxu0 %v2605_v61  ;;  %585 = vmatprep.subr.mxu1 %v2610_v62 }
  0x4a   :  { %276 = vmatprep.mubr.f32.mxu0 %v3655_v3  ;;  %389 = vmatprep.mubr.f32.mxu1 %v3655_v3  ;;  %v2670_v3 = vld [vmem:[%s3648_s2] sm:$0xff] }
  0x4b   :  { %515 = vmatpush1.msra.mxu0 %v2619_v63  ;;  %586 = vmatpush1.msra.mxu1 %v2624_v0  ;;  %3767 = vst [vmem:[#allocation25_spill] sm:$0xff] %v2670_v3 }
  0x4c   :  { %277 = vmatmul.mubr.f32.gmra.mxu0 %v169_v1  ;;  %390 = vmatmul.mubr.f32.gmra.mxu1 %v169_v1  ;;  %v2677_v1 = vld [vmem:[%s3648_s2 + $0x10] sm:$0xff] }
  0x4d   :  { %516 = vmatprep.subr.mxu0 %v2636_v11  ;;  %587 = vmatprep.subr.mxu1 %v2641_v20  ;;  %3768 = vst [vmem:[#allocation26_spill] sm:$0xff] %v2677_v1  ;;  %v30_v20 = vld [vmem:[%s3649_s4] sm:$0xff]  ;;  %v3769_v11 = vmov 0.0  }
  0x4e   :  { %517 = vmatpush1.msra.mxu0 %v2648_v29  ;;  %588 = vmatpush1.msra.mxu1 %v2653_v38 }
  0x4f   :  { %518 = vmatprep.subr.mxu0 %v2658_v47  ;;  %589 = vmatprep.subr.mxu1 %v2663_v56 }
  0x50   :  { %519 = vmatpush1.msra.mxu0 %v2670_v3  ;;  %552 = vmatprep.mubr.f32.mxu0 %v3769_v11 }
  0x51   :  { %590 = vmatpush1.msra.mxu1 %v2677_v1  ;;  %623 = vmatprep.mubr.f32.mxu1 %v3769_v11 }
  0x52   :  { %553 = vmatmul.mubr.f32.vlgmr.msra.gmra.mxu0 %v30_v20  ;;  %624 = vmatmul.mubr.f32.vlgmr.msra.gmra.mxu1 %v30_v20  ;;  %v3770_v20 = vld [vmem:[#allocation19_spill] sm:$0xff] }
  0x53   :  { %658 = vmatprep.subr.mxu0 %v2267_v2  ;;  %729 = vmatprep.subr.mxu1 %v2272_v4 }
  0x54   :  { %659 = vmatpush1.msra.mxu0 %v2277_v5  ;;  %730 = vmatpush1.msra.mxu1 %v2282_v6 }
  0x55   :  { %660 = vmatprep.subr.mxu0 %v2287_v7  ;;  %731 = vmatprep.subr.mxu1 %v2292_v8 }
  0x56   :  { %661 = vmatpush1.msra.mxu0 %v2301_v9  ;;  %732 = vmatpush1.msra.mxu1 %v2306_v10 }
  0x57   :  { %662 = vmatprep.subr.mxu0 %v2318_v12  ;;  %733 = vmatprep.subr.mxu1 %v2323_v13 }
  0x58   :  { %663 = vmatpush1.msra.mxu0 %v2330_v14  ;;  %734 = vmatpush1.msra.mxu1 %v2335_v15 }
  0x59   :  { %664 = vmatprep.subr.mxu0 %v2340_v16  ;;  %735 = vmatprep.subr.mxu1 %v2345_v17 }
  0x5a   :  { %665 = vmatpush1.msra.mxu0 %v2354_v18  ;;  %736 = vmatpush1.msra.mxu1 %v2359_v19 }
  0x5b   :  { %666 = vmatprep.subr.mxu0 %v2371_v21  ;;  %737 = vmatprep.subr.mxu1 %v2376_v22 }
  0x5c   :  { %667 = vmatpush1.msra.mxu0 %v2383_v23  ;;  %738 = vmatpush1.msra.mxu1 %v2388_v24 }
  0x5d   :  { %668 = vmatprep.subr.mxu0 %v2393_v25  ;;  %739 = vmatprep.subr.mxu1 %v2398_v26 }
  0x5e   :  { %669 = vmatpush1.msra.mxu0 %v2407_v27  ;;  %740 = vmatpush1.msra.mxu1 %v2412_v28 }
  0x5f   :  { %670 = vmatprep.subr.mxu0 %v2424_v30  ;;  %741 = vmatprep.subr.mxu1 %v2429_v31 }
  0x60   :  { %671 = vmatpush1.msra.mxu0 %v2436_v32  ;;  %742 = vmatpush1.msra.mxu1 %v2441_v33 }
  0x61   :  { %672 = vmatprep.subr.mxu0 %v2446_v34  ;;  %743 = vmatprep.subr.mxu1 %v2451_v35 }
  0x62   :  { %673 = vmatpush1.msra.mxu0 %v2460_v36  ;;  %744 = vmatpush1.msra.mxu1 %v2465_v37 }
  0x63   :  { %674 = vmatprep.subr.mxu0 %v2477_v39  ;;  %745 = vmatprep.subr.mxu1 %v2482_v40 }
  0x64   :  { %675 = vmatpush1.msra.mxu0 %v2489_v41  ;;  %746 = vmatpush1.msra.mxu1 %v2494_v42 }
  0x65   :  { %676 = vmatprep.subr.mxu0 %v2499_v43  ;;  %747 = vmatprep.subr.mxu1 %v2504_v44 }
  0x66   :  { %677 = vmatpush1.msra.mxu0 %v2513_v45  ;;  %748 = vmatpush1.msra.mxu1 %v2518_v46 }
  0x67   :  { %678 = vmatprep.subr.mxu0 %v2530_v48  ;;  %749 = vmatprep.subr.mxu1 %v2535_v49 }
  0x68   :  { %679 = vmatpush1.msra.mxu0 %v2542_v50  ;;  %750 = vmatpush1.msra.mxu1 %v2547_v51 }
  0x69   :  { %680 = vmatprep.subr.mxu0 %v2552_v52  ;;  %751 = vmatprep.subr.mxu1 %v2557_v53 }
  0x6a   :  { %681 = vmatpush1.msra.mxu0 %v2566_v54  ;;  %752 = vmatpush1.msra.mxu1 %v2571_v55  ;;  %v3771_v54 = vld [vmem:[#allocation20_spill] sm:$0xff] }
  0x6b   :  { %682 = vmatprep.subr.mxu0 %v2583_v57  ;;  %753 = vmatprep.subr.mxu1 %v2588_v58 }
  0x6c   :  { %683 = vmatpush1.msra.mxu0 %v2595_v59  ;;  %754 = vmatpush1.msra.mxu1 %v2600_v60 }
  0x6d   :  { %684 = vmatprep.subr.mxu0 %v2605_v61  ;;  %755 = vmatprep.subr.mxu1 %v2610_v62 }
  0x6e   :  { %685 = vmatpush1.msra.mxu0 %v2619_v63  ;;  %756 = vmatpush1.msra.mxu1 %v2624_v0 }
  0x6f   :  { %686 = vmatprep.subr.mxu0 %v3770_v20  ;;  %757 = vmatprep.subr.mxu1 %v3771_v54  ;;  %v398_v54 = vlaneseq }
  0x70   :  { %687 = vmatpush1.msra.mxu0 %v2648_v29  ;;  %758 = vmatpush1.msra.mxu1 %v2653_v38 }
  0x71   :  { %688 = vmatprep.subr.mxu0 %v2658_v47  ;;  %759 = vmatprep.subr.mxu1 %v2663_v56  ;;  %v399_v29 = vshrl.u32 %v398_v54, 7 }
  0x72   :  { %689 = vmatpush1.msra.mxu0 %v2670_v3  ;;  %722 = vmatprep.mubr.f32.mxu0 %v3769_v11  ;;  %v396_v3 = vld [vmem:[%s3650_s3] sm:$0xf] }
  0x73   :  { %760 = vmatpush1.msra.mxu1 %v2677_v1  ;;  %793 = vmatprep.mubr.f32.mxu1 %v3769_v11  ;;  %v400_v47 = vsub.s32 0, %v399_v29  ;;  %v408_v56 = vsub.s32 2, %v399_v29  ;;  %v404_v11 = vsub.s32 1, %v399_v29 }
  0x74   :  { %829 = vmatprep.subr.mxu0 %v2267_v2  ;;  %900 = vmatprep.subr.mxu1 %v2272_v4  ;;  %v412_v2 = vsub.s32 3, %v399_v29 }
  0x75   :  { %v401_v63 = vrot.slane %v396_v3, %v400_v47  ;;  %v2767_v4 = vrot.slane %v396_v3, %v408_v56  ;;  %v405_v61 = vrot.slane %v396_v3, %v404_v11 }
  0x76   :  { %v2769_v60 = vrot.slane %v396_v3, %v412_v2 }
  0xe2   :  { %v2756_v20 = vpop.f32.mrf.mxu0  ;;  %v2758_v38 = vpop.f32.mrf.mxu1 }
  0xe4   :  { %v2763_v0 = vpop.f32.mrf.mxu0  ;;  %v2765_v1 = vpop.f32.mrf.mxu1 }
  0xe8   :  { %v242_v54 = vpop.f32.mrf.mxu0  ;;  %v355_v62 = vpop.f32.mrf.mxu1 }
  0xe9   :  { %v2771_v59 = vadd.f32 %v401_v63, %v242_v54  ;;  %v2774_v58 = vadd.f32 %v2767_v4, %v355_v62 }
  0xea   :  { %v244_v57 = vpop.f32.mrf.mxu0  ;;  %v357_v55 = vpop.f32.mrf.mxu1 }
  0xeb   :  { %3772 = vst [vmem:[#allocation27_spill] sm:$0xff] %v2771_v59  ;;  %3773 = vst [vmem:[#allocation28_spill] sm:$0xff] %v2774_v58  ;;  %v2776_v53 = vadd.f32 %v405_v61, %v244_v57  ;;  %v2779_v52 = vadd.f32 %v2769_v60, %v357_v55 }
  0xed   :  { %3774 = vst [vmem:[#allocation29_spill] sm:$0xff] %v2776_v53  ;;  %3775 = vst [vmem:[#allocation30_spill] sm:$0xff] %v2779_v52 }
  0xee   :  { %v248_v29 = vpop.f32.mrf.mxu0  ;;  %v361_v47 = vpop.f32.mrf.mxu1 }
  0xef   :  { %v2781_v56 = vadd.f32 %v401_v63, %v248_v29  ;;  %v2784_v11 = vadd.f32 %v2767_v4, %v361_v47 }
  0xf0   :  { %v250_v3 = vpop.f32.mrf.mxu0  ;;  %v363_v2 = vpop.f32.mrf.mxu1 }
  0xf1   :  { %3776 = vst [vmem:[#allocation31_spill] sm:$0xff] %v2781_v56  ;;  %3777 = vst [vmem:[#allocation32_spill] sm:$0xff] %v2784_v11  ;;  %v2786_v54 = vadd.f32 %v405_v61, %v250_v3  ;;  %v2789_v62 = vadd.f32 %v2769_v60, %v363_v2 }
  0xf3   :  { %3778 = vst [vmem:[#allocation33_spill] sm:$0xff] %v2786_v54  ;;  %3779 = vst [vmem:[#allocation34_spill] sm:$0xff] %v2789_v62 }
  0xf4   :  { %v254_v58 = vpop.f32.mrf.mxu0  ;;  %v367_v57 = vpop.f32.mrf.mxu1 }
  0xf5   :  { %v2791_v53 = vadd.f32 %v401_v63, %v254_v58  ;;  %v2794_v55 = vadd.f32 %v2767_v4, %v367_v57 }
  0xf6   :  { %v256_v52 = vpop.f32.mrf.mxu0  ;;  %v369_v29 = vpop.f32.mrf.mxu1 }
  0xf7   :  { %3780 = vst [vmem:[#allocation35_spill] sm:$0xff] %v2791_v53  ;;  %3781 = vst [vmem:[#allocation36_spill] sm:$0xff] %v2794_v55  ;;  %v2796_v56 = vadd.f32 %v405_v61, %v256_v52  ;;  %v2799_v47 = vadd.f32 %v2769_v60, %v369_v29 }
  0xf9   :  { %3782 = vst [vmem:[#allocation37_spill] sm:$0xff] %v2796_v56  ;;  %3783 = vst [vmem:[#allocation38_spill] sm:$0xff] %v2799_v47 }
  0xfa   :  { %v260_v11 = vpop.f32.mrf.mxu0  ;;  %v373_v3 = vpop.f32.mrf.mxu1 }
  0xfb   :  { %v2801_v54 = vadd.f32 %v401_v63, %v260_v11  ;;  %v2804_v2 = vadd.f32 %v2767_v4, %v373_v3 }
  0xfc   :  { %v262_v62 = vpop.f32.mrf.mxu0  ;;  %v375_v58 = vpop.f32.mrf.mxu1 }
  0xfd   :  { %3784 = vst [vmem:[#allocation39_spill] sm:$0xff] %v2801_v54  ;;  %3785 = vst [vmem:[#allocation40_spill] sm:$0xff] %v2804_v2  ;;  %v2806_v53 = vadd.f32 %v405_v61, %v262_v62  ;;  %v2809_v57 = vadd.f32 %v2769_v60, %v375_v58 }
  0xff   :  { %3786 = vst [vmem:[#allocation41_spill] sm:$0xff] %v2806_v53  ;;  %3787 = vst [vmem:[#allocation42_spill] sm:$0xff] %v2809_v57 }
 0x100   :  { %v266_v55 = vpop.f32.mrf.mxu0  ;;  %v379_v52 = vpop.f32.mrf.mxu1 }
 0x101   :  { %v2811_v56 = vadd.f32 %v401_v63, %v266_v55  ;;  %v2814_v29 = vadd.f32 %v2767_v4, %v379_v52 }
 0x102   :  { %v268_v47 = vpop.f32.mrf.mxu0  ;;  %v381_v11 = vpop.f32.mrf.mxu1 }
 0x103   :  { %3788 = vst [vmem:[#allocation43_spill] sm:$0xff] %v2811_v56  ;;  %3789 = vst [vmem:[#allocation44_spill] sm:$0xff] %v2814_v29  ;;  %v2816_v54 = vadd.f32 %v405_v61, %v268_v47  ;;  %v2819_v3 = vadd.f32 %v2769_v60, %v381_v11 }
 0x105   :  { %3790 = vst [vmem:[#allocation45_spill] sm:$0xff] %v2816_v54  ;;  %3791 = vst [vmem:[#allocation46_spill] sm:$0xff] %v2819_v3 }
 0x106   :  { %v272_v2 = vpop.f32.mrf.mxu0  ;;  %v385_v62 = vpop.f32.mrf.mxu1 }
 0x107   :  { %v2821_v53 = vadd.f32 %v401_v63, %v272_v2  ;;  %v2824_v58 = vadd.f32 %v2767_v4, %v385_v62 }
 0x108   :  { %v274_v57 = vpop.f32.mrf.mxu0  ;;  %v387_v55 = vpop.f32.mrf.mxu1 }
 0x109   :  { %3792 = vst [vmem:[#allocation47_spill] sm:$0xff] %v2821_v53  ;;  %3793 = vst [vmem:[#allocation48_spill] sm:$0xff] %v2824_v58  ;;  %v2826_v56 = vadd.f32 %v405_v61, %v274_v57  ;;  %v2829_v52 = vadd.f32 %v2769_v60, %v387_v55  ;;  %v418_v57 = vadd.f32 %v401_v63, %v2756_v20 }
 0x10a   :  { %v419_v55 = vadd.f32 %v405_v61, %v2763_v0 }
 0x10b   :  { %3794 = vst [vmem:[#allocation49_spill] sm:$0xff] %v2826_v56  ;;  %3795 = vst [vmem:[#allocation50_spill] sm:$0xff] %v2829_v52 }
 0x10c   :  { %v278_v29 = vpop.f32.mrf.mxu0  ;;  %v391_v47 = vpop.f32.mrf.mxu1 }
 0x10d   :  { %v2831_v54 = vadd.f32 %v401_v63, %v278_v29  ;;  %v2834_v11 = vadd.f32 %v2767_v4, %v391_v47  ;;  %v420_v47 = vadd.f32 %v2767_v4, %v2758_v38  ;;  %v32_v4 = vld [vmem:[%s3651_s5] sm:$0xff] }
 0x10e   :  { %v280_v3 = vpop.f32.mrf.mxu0  ;;  %v393_v2 = vpop.f32.mrf.mxu1 }
 0x10f   :  { %3796 = vst [vmem:[#allocation51_spill] sm:$0xff] %v2831_v54  ;;  %3797 = vst [vmem:[#allocation52_spill] sm:$0xff] %v2834_v11  ;;  %v2836_v53 = vadd.f32 %v405_v61, %v280_v3  ;;  %v2839_v62 = vadd.f32 %v2769_v60, %v393_v2  ;;  %v421_v2 = vadd.f32 %v2769_v60, %v2765_v1 }
 0x111   :  { %3798 = vst [vmem:[#allocation53_spill] sm:$0xff] %v2836_v53  ;;  %3799 = vst [vmem:[#allocation54_spill] sm:$0xff] %v2839_v62  ;;  %v3820_v62 = vld [vmem:[#allocation26_spill] sm:$0xff] }
 0x112   :  { %v554_v58 = vpop.f32.mrf.mxu0  ;;  %v625_v54 = vpop.f32.mrf.mxu1 }
 0x113   :  { %v630_v52 = vadd.f32 %v554_v58, %v418_v57  ;;  %v632_v3 = vadd.f32 %v625_v54, %v420_v47  ;;  %v3800_v47 = vld [vmem:[#allocation7_spill] sm:$0xff] }
 0x114   :  { %v556_v56 = vpop.f32.mrf.mxu0  ;;  %v627_v53 = vpop.f32.mrf.mxu1 }
 0x115   :  { %v634_v59 = vmul.f32 0.5, %v630_v52  ;;  %v631_v29 = vadd.f32 %v556_v56, %v419_v55  ;;  %v633_v63 = vadd.f32 %v627_v53, %v421_v2  ;;  %v3802_v2 = vld [vmem:[#allocation9_spill] sm:$0xff] }
 0x117   :  { %1877 = vtanh.f32 %v634_v59  ;;  %v638_v11 = vmul.f32 0.5, %v631_v29  ;;  %v643_v20 = vmul.f32 0.5, %v633_v63  ;;  %v3803_v63 = vld [vmem:[#allocation10_spill] sm:$0xff] }
 0x119   :  { %1879 = vtanh.f32 %v638_v11 }
 0x11a   :  { %1881 = vtanh.f32 %v632_v3  ;;  %v3801_v3 = vld [vmem:[#allocation8_spill] sm:$0xff] }
 0x11b   :  { %1883 = vtanh.f32 %v643_v20  ;;  %v3804_v20 = vld [vmem:[#allocation11_spill] sm:$0xff] }
 0x124   :  { %v1878_v61 = vpop.eup %1877 }
 0x125   :  { %v636_v0 = vmul.f32 0.5, %v1878_v61  ;;  %v3805_v61 = vld [vmem:[#allocation12_spill] sm:$0xff] }
 0x126   :  { %v1880_v58 = vpop.eup %1879 }
 0x127   :  { %v637_v52 = vadd.f32 0.5, %v636_v0  ;;  %v640_v56 = vmul.f32 0.5, %v1880_v58  ;;  %v1882_v38 = vpop.eup %1881  ;;  %v3806_v0 = vld [vmem:[#allocation13_spill] sm:$0xff]  ;;  %v3807_v58 = vld [vmem:[#allocation14_spill] sm:$0xff] }
 0x128   :  { %v1884_v53 = vpop.eup %1883 }
 0x129   :  { %v641_v59 = vadd.f32 0.5, %v640_v56  ;;  %v648_v11 = vmul.f32 %v1882_v38, %v637_v52  ;;  %v645_v60 = vmul.f32 0.5, %v1884_v53  ;;  %v3808_v52 = vld [vmem:[#allocation15_spill] sm:$0xff]  ;;  %v3809_v56 = vld [vmem:[#allocation16_spill] sm:$0xff]  ;;  %v3815_v53 = vld [vmem:[#allocation22_spill] sm:$0xff] }
 0x12a   :  { %v3812_v38 = vld [vmem:[#allocation19_spill] sm:$0xff] }
 0x12b   :  { %v647_v54 = vmul.f32 %v641_v59, %v32_v4  ;;  %v646_v1 = vadd.f32 0.5, %v645_v60  ;;  %v3810_v4 = vld [vmem:[#allocation17_spill] sm:$0xff]  ;;  %v3811_v59 = vld [vmem:[#allocation18_spill] sm:$0xff]  ;;  %v3816_v60 = vld [vmem:[#allocation23_spill] sm:$0xff] }
 0x12d   :  { %v2850_v57 = vadd.f32 %v648_v11, %v647_v54  ;;  %v3813_v54 = vld [vmem:[#allocation20_spill] sm:$0xff]  ;;  %v3814_v11 = vld [vmem:[#allocation21_spill] sm:$0xff] }
 0x12f   :  { %1885 = vtanh.f32 %v2850_v57 }
 0x13c   :  { %v1886_v55 = vpop.eup %1885 }
 0x13d   :  { %v651_v29 = vmul.f32 %v1886_v55, %v646_v1  ;;  %v3817_v1 = vld [vmem:[#allocation24_spill] sm:$0xff]  ;;  %v3818_v55 = vld [vmem:[#allocation25_spill] sm:$0xff] }
 0x13f   :  { %652 = vst [vmem:[%s3652_s6] sm:$0xff] %v651_v29  ;;  %723 = vmatmul.mubr.f32.vlgmr.msra.gmra.mxu0 %v651_v29  ;;  %794 = vmatmul.mubr.f32.vlgmr.msra.gmra.mxu1 %v651_v29  ;;  %v3819_v29 = vmov 0.0  }
 0x140   :  { %830 = vmatpush1.msra.mxu0 %v2277_v5  ;;  %901 = vmatpush1.msra.mxu1 %v2282_v6 }
 0x141   :  { %831 = vmatprep.subr.mxu0 %v2287_v7  ;;  %902 = vmatprep.subr.mxu1 %v2292_v8 }
 0x142   :  { %832 = vmatpush1.msra.mxu0 %v2301_v9  ;;  %903 = vmatpush1.msra.mxu1 %v2306_v10 }
 0x143   :  { %833 = vmatprep.subr.mxu0 %v2318_v12  ;;  %904 = vmatprep.subr.mxu1 %v2323_v13 }
 0x144   :  { %834 = vmatpush1.msra.mxu0 %v2330_v14  ;;  %905 = vmatpush1.msra.mxu1 %v2335_v15 }
 0x145   :  { %835 = vmatprep.subr.mxu0 %v2340_v16  ;;  %906 = vmatprep.subr.mxu1 %v2345_v17 }
 0x146   :  { %836 = vmatpush1.msra.mxu0 %v2354_v18  ;;  %907 = vmatpush1.msra.mxu1 %v2359_v19 }
 0x147   :  { %837 = vmatprep.subr.mxu0 %v2371_v21  ;;  %908 = vmatprep.subr.mxu1 %v2376_v22 }
 0x148   :  { %838 = vmatpush1.msra.mxu0 %v2383_v23  ;;  %909 = vmatpush1.msra.mxu1 %v2388_v24 }
 0x149   :  { %839 = vmatprep.subr.mxu0 %v2393_v25  ;;  %910 = vmatprep.subr.mxu1 %v2398_v26 }
 0x14a   :  { %840 = vmatpush1.msra.mxu0 %v2407_v27  ;;  %911 = vmatpush1.msra.mxu1 %v2412_v28 }
 0x14b   :  { %841 = vmatprep.subr.mxu0 %v2424_v30  ;;  %912 = vmatprep.subr.mxu1 %v2429_v31 }
 0x14c   :  { %842 = vmatpush1.msra.mxu0 %v2436_v32  ;;  %913 = vmatpush1.msra.mxu1 %v2441_v33 }
 0x14d   :  { %843 = vmatprep.subr.mxu0 %v2446_v34  ;;  %914 = vmatprep.subr.mxu1 %v2451_v35 }
 0x14e   :  { %844 = vmatpush1.msra.mxu0 %v2460_v36  ;;  %915 = vmatpush1.msra.mxu1 %v2465_v37 }
 0x14f   :  { %845 = vmatprep.subr.mxu0 %v2477_v39  ;;  %916 = vmatprep.subr.mxu1 %v2482_v40 }
 0x150   :  { %846 = vmatpush1.msra.mxu0 %v2489_v41  ;;  %917 = vmatpush1.msra.mxu1 %v2494_v42 }
 0x151   :  { %847 = vmatprep.subr.mxu0 %v2499_v43  ;;  %918 = vmatprep.subr.mxu1 %v2504_v44 }
 0x152   :  { %848 = vmatpush1.msra.mxu0 %v2513_v45  ;;  %919 = vmatpush1.msra.mxu1 %v2518_v46 }
 0x153   :  { %849 = vmatprep.subr.mxu0 %v2530_v48  ;;  %920 = vmatprep.subr.mxu1 %v2535_v49 }
 0x154   :  { %850 = vmatpush1.msra.mxu0 %v2542_v50  ;;  %921 = vmatpush1.msra.mxu1 %v2547_v51 }
 0x155   :  { %851 = vmatprep.subr.mxu0 %v3800_v47  ;;  %922 = vmatprep.subr.mxu1 %v3801_v3 }
 0x156   :  { %852 = vmatpush1.msra.mxu0 %v3802_v2  ;;  %923 = vmatpush1.msra.mxu1 %v3803_v63 }
 0x157   :  { %853 = vmatprep.subr.mxu0 %v3804_v20  ;;  %924 = vmatprep.subr.mxu1 %v3805_v61 }
 0x158   :  { %854 = vmatpush1.msra.mxu0 %v3806_v0  ;;  %925 = vmatpush1.msra.mxu1 %v3807_v58 }
 0x159   :  { %855 = vmatprep.subr.mxu0 %v3808_v52  ;;  %926 = vmatprep.subr.mxu1 %v3809_v56  ;;  %v3824_v52 = vld [vmem:[#allocation29_spill] sm:$0xff] }
 0x15a   :  { %856 = vmatpush1.msra.mxu0 %v3810_v4  ;;  %927 = vmatpush1.msra.mxu1 %v3811_v59  ;;  %v3821_v59 = vld [vmem:[#allocation5_spill] sm:$0xff] }
 0x15b   :  { %857 = vmatprep.subr.mxu0 %v3812_v38  ;;  %928 = vmatprep.subr.mxu1 %v3813_v54  ;;  %v3822_v38 = vld [vmem:[#allocation6_spill] sm:$0xff] }
 0x15c   :  { %858 = vmatpush1.msra.mxu0 %v3814_v11  ;;  %929 = vmatpush1.msra.mxu1 %v3815_v53  ;;  %v3823_v11 = vld [vmem:[#allocation27_spill] sm:$0xff] }
 0x15d   :  { %859 = vmatprep.subr.mxu0 %v3816_v60  ;;  %930 = vmatprep.subr.mxu1 %v3817_v1 }
 0x15e   :  { %860 = vmatpush1.msra.mxu0 %v3818_v55  ;;  %893 = vmatprep.mubr.f32.mxu0 %v3819_v29  ;;  %v3825_v55 = vld [vmem:[#allocation28_spill] sm:$0xff] }
 0x15f   :  { %931 = vmatpush1.msra.mxu1 %v3820_v62  ;;  %964 = vmatprep.mubr.f32.mxu1 %v3819_v29  ;;  %v3826_v29 = vld [vmem:[#allocation30_spill] sm:$0xff] }
 0x160   :  { %1000 = vmatprep.subr.mxu0 %v3821_v59  ;;  %1071 = vmatprep.subr.mxu1 %v3822_v38 }
 0x1ff   :  { %v724_v54 = vpop.f32.mrf.mxu0  ;;  %v795_v53 = vpop.f32.mrf.mxu1 }
 0x200   :  { %v800_v4 = vadd.f32 %v724_v54, %v3823_v11  ;;  %v802_v58 = vadd.f32 %v795_v53, %v3825_v55 }
 0x201   :  { %v726_v56 = vpop.f32.mrf.mxu0  ;;  %v797_v62 = vpop.f32.mrf.mxu1 }
 0x202   :  { %v804_v60 = vmul.f32 0.5, %v800_v4  ;;  %v801_v1 = vadd.f32 %v726_v56, %v3824_v52  ;;  %v803_v61 = vadd.f32 %v797_v62, %v3826_v29 }
 0x204   :  { %1887 = vtanh.f32 %v804_v60  ;;  %v808_v0 = vmul.f32 0.5, %v801_v1  ;;  %v813_v59 = vmul.f32 0.5, %v803_v61  ;;  %v3851_v1 = vld [vmem:[#allocation32_spill] sm:$0xff] }
 0x206   :  { %1889 = vtanh.f32 %v808_v0 }
 0x207   :  { %1891 = vtanh.f32 %v802_v58 }
 0x208   :  { %1893 = vtanh.f32 %v813_v59 }
 0x211   :  { %v1888_v20 = vpop.eup %1887 }
 0x212   :  { %v806_v38 = vmul.f32 0.5, %v1888_v20  ;;  %v3850_v20 = vld [vmem:[#allocation33_spill] sm:$0xff] }
 0x213   :  { %v1890_v63 = vpop.eup %1889 }
 0x214   :  { %v807_v2 = vadd.f32 0.5, %v806_v38  ;;  %v810_v54 = vmul.f32 0.5, %v1890_v63  ;;  %v1892_v11 = vpop.eup %1891  ;;  %v3852_v38 = vld [vmem:[#allocation34_spill] sm:$0xff] }
 0x215   :  { %v1894_v0 = vpop.eup %1893 }
 0x216   :  { %v811_v4 = vadd.f32 0.5, %v810_v54  ;;  %v818_v3 = vmul.f32 %v1892_v11, %v807_v2  ;;  %v815_v58 = vmul.f32 0.5, %v1894_v0 }
 0x218   :  { %v817_v52 = vmul.f32 %v811_v4, %v2850_v57  ;;  %v816_v53 = vadd.f32 0.5, %v815_v58 }
 0x21a   :  { %v2927_v56 = vadd.f32 %v818_v3, %v817_v52 }
 0x21c   :  { %1895 = vtanh.f32 %v2927_v56 }
 0x229   :  { %v1896_v62 = vpop.eup %1895 }
 0x22a   :  { %v821_v61 = vmul.f32 %v1896_v62, %v816_v53 }
 0x22c   :  { %1869 = vst [vmem:[%s3652_s6 + $0x8] sm:$0xff] %v821_v61  ;;  %894 = vmatmul.mubr.f32.vlgmr.msra.gmra.mxu0 %v821_v61  ;;  %965 = vmatmul.mubr.f32.vlgmr.msra.gmra.mxu1 %v821_v61 }
 0x22d   :  { %1001 = vmatpush1.msra.mxu0 %v2277_v5  ;;  %1072 = vmatpush1.msra.mxu1 %v2282_v6  ;;  %v3827_v5 = vld [vmem:[#allocation8_spill] sm:$0xff]  ;;  %v3828_v6 = vld [vmem:[#allocation9_spill] sm:$0xff] }
 0x22e   :  { %1002 = vmatprep.subr.mxu0 %v2287_v7  ;;  %1073 = vmatprep.subr.mxu1 %v2292_v8  ;;  %v3829_v7 = vld [vmem:[#allocation10_spill] sm:$0xff]  ;;  %v3830_v8 = vld [vmem:[#allocation11_spill] sm:$0xff] }
 0x22f   :  { %1003 = vmatpush1.msra.mxu0 %v2301_v9  ;;  %1074 = vmatpush1.msra.mxu1 %v2306_v10  ;;  %v3831_v9 = vld [vmem:[#allocation12_spill] sm:$0xff]  ;;  %v3832_v10 = vld [vmem:[#allocation13_spill] sm:$0xff] }
 0x230   :  { %1004 = vmatprep.subr.mxu0 %v2318_v12  ;;  %1075 = vmatprep.subr.mxu1 %v2323_v13  ;;  %v3833_v12 = vld [vmem:[#allocation14_spill] sm:$0xff]  ;;  %v3834_v13 = vld [vmem:[#allocation15_spill] sm:$0xff] }
 0x231   :  { %1005 = vmatpush1.msra.mxu0 %v2330_v14  ;;  %1076 = vmatpush1.msra.mxu1 %v2335_v15  ;;  %v3835_v14 = vld [vmem:[#allocation16_spill] sm:$0xff]  ;;  %v3836_v15 = vld [vmem:[#allocation17_spill] sm:$0xff] }
 0x232   :  { %1006 = vmatprep.subr.mxu0 %v2340_v16  ;;  %1077 = vmatprep.subr.mxu1 %v2345_v17  ;;  %v3837_v16 = vld [vmem:[#allocation18_spill] sm:$0xff]  ;;  %v3838_v17 = vld [vmem:[#allocation19_spill] sm:$0xff] }
 0x233   :  { %1007 = vmatpush1.msra.mxu0 %v2354_v18  ;;  %1078 = vmatpush1.msra.mxu1 %v2359_v19  ;;  %v3839_v18 = vld [vmem:[#allocation20_spill] sm:$0xff]  ;;  %v3840_v19 = vld [vmem:[#allocation21_spill] sm:$0xff] }
 0x234   :  { %1008 = vmatprep.subr.mxu0 %v2371_v21  ;;  %1079 = vmatprep.subr.mxu1 %v2376_v22  ;;  %v3841_v21 = vld [vmem:[#allocation22_spill] sm:$0xff]  ;;  %v3842_v22 = vld [vmem:[#allocation23_spill] sm:$0xff] }
 0x235   :  { %1009 = vmatpush1.msra.mxu0 %v2383_v23  ;;  %1080 = vmatpush1.msra.mxu1 %v2388_v24  ;;  %v3843_v23 = vld [vmem:[#allocation24_spill] sm:$0xff]  ;;  %v3844_v24 = vld [vmem:[#allocation25_spill] sm:$0xff] }
 0x236   :  { %1010 = vmatprep.subr.mxu0 %v2393_v25  ;;  %1081 = vmatprep.subr.mxu1 %v2398_v26  ;;  %v3845_v25 = vmov 0.0   ;;  %v3846_v26 = vld [vmem:[#allocation26_spill] sm:$0xff] }
 0x237   :  { %1011 = vmatpush1.msra.mxu0 %v2407_v27  ;;  %1082 = vmatpush1.msra.mxu1 %v2412_v28  ;;  %v3000_v27 = vld [vmem:[%s3648_s2 + $0x1e8] sm:$0xff]  ;;  %v3006_v28 = vld [vmem:[%s3648_s2 + $0x1f8] sm:$0xff] }
 0x238   :  { %1012 = vmatprep.subr.mxu0 %v2424_v30  ;;  %1083 = vmatprep.subr.mxu1 %v2429_v31  ;;  %3847 = vst [vmem:[#allocation7_spill] sm:$0xff] %v3000_v27  ;;  %3848 = vst [vmem:[#allocation5_spill] sm:$0xff] %v3006_v28  ;;  %v3849_v31 = vld [vmem:[#allocation31_spill] sm:$0xff] }
 0x239   :  { %1013 = vmatpush1.msra.mxu0 %v2436_v32  ;;  %1084 = vmatpush1.msra.mxu1 %v2441_v33 }
 0x23a   :  { %1014 = vmatprep.subr.mxu0 %v2446_v34  ;;  %1085 = vmatprep.subr.mxu1 %v2451_v35 }
 0x23b   :  { %1015 = vmatpush1.msra.mxu0 %v2460_v36  ;;  %1086 = vmatpush1.msra.mxu1 %v2465_v37 }
 0x23c   :  { %1016 = vmatprep.subr.mxu0 %v2477_v39  ;;  %1087 = vmatprep.subr.mxu1 %v2482_v40 }
 0x23d   :  { %1017 = vmatpush1.msra.mxu0 %v2489_v41  ;;  %1088 = vmatpush1.msra.mxu1 %v2494_v42 }
 0x23e   :  { %1018 = vmatprep.subr.mxu0 %v2499_v43  ;;  %1089 = vmatprep.subr.mxu1 %v2504_v44 }
 0x23f   :  { %1019 = vmatpush1.msra.mxu0 %v2513_v45  ;;  %1090 = vmatpush1.msra.mxu1 %v2518_v46 }
 0x240   :  { %1020 = vmatprep.subr.mxu0 %v2530_v48  ;;  %1091 = vmatprep.subr.mxu1 %v2535_v49 }
 0x241   :  { %1021 = vmatpush1.msra.mxu0 %v2542_v50  ;;  %1092 = vmatpush1.msra.mxu1 %v2547_v51 }
 0x242   :  { %1022 = vmatprep.subr.mxu0 %v3800_v47  ;;  %1093 = vmatprep.subr.mxu1 %v3827_v5 }
 0x243   :  { %1023 = vmatpush1.msra.mxu0 %v3828_v6  ;;  %1094 = vmatpush1.msra.mxu1 %v3829_v7 }
 0x244   :  { %1024 = vmatprep.subr.mxu0 %v3830_v8  ;;  %1095 = vmatprep.subr.mxu1 %v3831_v9 }
 0x245   :  { %1025 = vmatpush1.msra.mxu0 %v3832_v10  ;;  %1096 = vmatpush1.msra.mxu1 %v3833_v12 }
 0x246   :  { %1026 = vmatprep.subr.mxu0 %v3834_v13  ;;  %1097 = vmatprep.subr.mxu1 %v3835_v14 }
 0x247   :  { %1027 = vmatpush1.msra.mxu0 %v3836_v15  ;;  %1098 = vmatpush1.msra.mxu1 %v3837_v16 }
 0x248   :  { %1028 = vmatprep.subr.mxu0 %v3838_v17  ;;  %1099 = vmatprep.subr.mxu1 %v3839_v18 }
 0x249   :  { %1029 = vmatpush1.msra.mxu0 %v3840_v19  ;;  %1100 = vmatpush1.msra.mxu1 %v3841_v21 }
 0x24a   :  { %1030 = vmatprep.subr.mxu0 %v3842_v22  ;;  %1101 = vmatprep.subr.mxu1 %v3843_v23 }
 0x24b   :  { %1031 = vmatpush1.msra.mxu0 %v3844_v24  ;;  %1064 = vmatprep.mubr.f32.mxu0 %v3845_v25 }
 0x24c   :  { %1102 = vmatpush1.msra.mxu1 %v3846_v26  ;;  %1135 = vmatprep.mubr.f32.mxu1 %v3845_v25 }
 0x24d   :  { %1171 = vmatprep.subr.mxu0 %v3000_v27  ;;  %1242 = vmatprep.subr.mxu1 %v3006_v28 }
 0x2ec   :  { %v895_v30 = vpop.f32.mrf.mxu0  ;;  %v966_v3 = vpop.f32.mrf.mxu1 }
 0x2ed   :  { %v971_v57 = vadd.f32 %v895_v30, %v3849_v31  ;;  %v973_v55 = vadd.f32 %v966_v3, %v3851_v1  ;;  %v3023_v1 = vld [vmem:[%s3648_s2 + $0x1e0] sm:$0xff] }
 0x2ee   :  { %v897_v2 = vpop.f32.mrf.mxu0  ;;  %v968_v59 = vpop.f32.mrf.mxu1 }
 0x2ef   :  { %v975_v63 = vmul.f32 0.5, %v971_v57  ;;  %v972_v60 = vadd.f32 %v897_v2, %v3850_v20  ;;  %v974_v54 = vadd.f32 %v968_v59, %v3852_v38  ;;  %v3047_v59 = vld [vmem:[%s3648_s2 + $0x1c0] sm:$0xff]  ;;  %v3053_v38 = vld [vmem:[%s3648_s2 + $0x1d0] sm:$0xff] }
 0x2f1   :  { %1897 = vtanh.f32 %v975_v63  ;;  %v979_v29 = vmul.f32 0.5, %v972_v60  ;;  %v984_v11 = vmul.f32 0.5, %v974_v54  ;;  %v3059_v54 = vld [vmem:[%s3648_s2 + $0x1a8] sm:$0xff] }
 0x2f3   :  { %1899 = vtanh.f32 %v979_v29  ;;  %v3041_v29 = vld [vmem:[%s3648_s2 + $0x1d8] sm:$0xff] }
 0x2f4   :  { %1901 = vtanh.f32 %v973_v55  ;;  %v3035_v55 = vld [vmem:[%s3648_s2 + $0x1c8] sm:$0xff] }
 0x2f5   :  { %1903 = vtanh.f32 %v984_v11  ;;  %v3065_v11 = vld [vmem:[%s3648_s2 + $0x1b8] sm:$0xff] }
 0x2fe   :  { %v1898_v4 = vpop.eup %1897 }
 0x2ff   :  { %v977_v52 = vmul.f32 0.5, %v1898_v4  ;;  %v3071_v4 = vld [vmem:[%s3648_s2 + $0x1a0] sm:$0xff] }
 0x300   :  { %v1900_v0 = vpop.eup %1899 }
 0x301   :  { %v978_v58 = vadd.f32 0.5, %v977_v52  ;;  %v981_v53 = vmul.f32 0.5, %v1900_v0  ;;  %v1902_v62 = vpop.eup %1901  ;;  %v3077_v52 = vld [vmem:[%s3648_s2 + $0x1b0] sm:$0xff]  ;;  %v3083_v0 = vld [vmem:[%s3648_s2 + $0x188] sm:$0xff] }
 0x302   :  { %v1904_v3 = vpop.eup %1903 }
 0x303   :  { %v982_v61 = vadd.f32 0.5, %v981_v53  ;;  %v989_v30 = vmul.f32 %v1902_v62, %v978_v58  ;;  %v986_v2 = vmul.f32 0.5, %v1904_v3  ;;  %v3089_v58 = vld [vmem:[%s3648_s2 + $0x198] sm:$0xff]  ;;  %v3095_v53 = vld [vmem:[%s3648_s2 + $0x180] sm:$0xff]  ;;  %v3101_v62 = vld [vmem:[%s3648_s2 + $0x190] sm:$0xff] }
 0x304   :  { %v3125_v3 = vld [vmem:[%s3648_s2 + $0x170] sm:$0xff] }
 0x305   :  { %v988_v31 = vmul.f32 %v982_v61, %v2927_v56  ;;  %v987_v63 = vadd.f32 0.5, %v986_v2  ;;  %v3029_v56 = vld [vmem:[%s3648_s2 + $0x1f0] sm:$0xff]  ;;  %v3107_v61 = vld [vmem:[%s3648_s2 + $0x168] sm:$0xff] }
 0x306   :  { %v3131_v2 = vld [vmem:[%s3648_s2 + $0x148] sm:$0xff] }
 0x307   :  { %v3014_v57 = vadd.f32 %v989_v30, %v988_v31  ;;  %v3113_v30 = vld [vmem:[%s3648_s2 + $0x178] sm:$0xff]  ;;  %v3119_v31 = vld [vmem:[%s3648_s2 + $0x160] sm:$0xff]  ;;  %3853 = vst [vmem:[#allocation6_spill] sm:$0xff] %v3131_v2 }
 0x309   :  { %1905 = vtanh.f32 %v3014_v57 }
 0x316   :  { %v1906_v20 = vpop.eup %1905 }
 0x317   :  { %v992_v60 = vmul.f32 %v1906_v20, %v987_v63  ;;  %v3137_v63 = vld [vmem:[%s3648_s2 + $0x158] sm:$0xff]  ;;  %v3143_v20 = vld [vmem:[%s3648_s2 + $0x140] sm:$0xff] }
 0x318   :  { %3854 = vst [vmem:[#allocation27_spill] sm:$0xff] %v3137_v63 }
 0x319   :  { %1870 = vst [vmem:[%s3652_s6 + $0x10] sm:$0xff] %v992_v60  ;;  %1065 = vmatmul.mubr.f32.vlgmr.msra.gmra.mxu0 %v992_v60  ;;  %1136 = vmatmul.mubr.f32.vlgmr.msra.gmra.mxu1 %v992_v60  ;;  %v3149_v60 = vld [vmem:[%s3648_s2 + $0x150] sm:$0xff] }
 0x31a   :  { %1172 = vmatpush1.msra.mxu0 %v3023_v1  ;;  %1243 = vmatpush1.msra.mxu1 %v3029_v56 }
 0x31b   :  { %1173 = vmatprep.subr.mxu0 %v3035_v55  ;;  %1244 = vmatprep.subr.mxu1 %v3041_v29 }
 0x31c   :  { %1174 = vmatpush1.msra.mxu0 %v3047_v59  ;;  %1245 = vmatpush1.msra.mxu1 %v3053_v38 }
 0x31d   :  { %1175 = vmatprep.subr.mxu0 %v3059_v54  ;;  %1246 = vmatprep.subr.mxu1 %v3065_v11 }
 0x31e   :  { %1176 = vmatpush1.msra.mxu0 %v3071_v4  ;;  %1247 = vmatpush1.msra.mxu1 %v3077_v52 }
 0x31f   :  { %1177 = vmatprep.subr.mxu0 %v3083_v0  ;;  %1248 = vmatprep.subr.mxu1 %v3089_v58 }
 0x320   :  { %1178 = vmatpush1.msra.mxu0 %v3095_v53  ;;  %1249 = vmatpush1.msra.mxu1 %v3101_v62 }
 0x321   :  { %1179 = vmatprep.subr.mxu0 %v3107_v61  ;;  %1250 = vmatprep.subr.mxu1 %v3113_v30 }
 0x322   :  { %1180 = vmatpush1.msra.mxu0 %v3119_v31  ;;  %1251 = vmatpush1.msra.mxu1 %v3125_v3 }
 0x323   :  { %1181 = vmatprep.subr.mxu0 %v3131_v2  ;;  %1252 = vmatprep.subr.mxu1 %v3137_v63  ;;  %v3155_v2 = vld [vmem:[%s3648_s2 + $0x128] sm:$0xff]  ;;  %v3161_v63 = vld [vmem:[%s3648_s2 + $0x138] sm:$0xff] }
 0x324   :  { %1182 = vmatpush1.msra.mxu0 %v3143_v20  ;;  %1253 = vmatpush1.msra.mxu1 %v3149_v60 }
 0x325   :  { %1183 = vmatprep.subr.mxu0 %v3155_v2  ;;  %1254 = vmatprep.subr.mxu1 %v3161_v63 }
 0x326   :  { %1184 = vmatpush1.msra.mxu0 %v2436_v32  ;;  %1255 = vmatpush1.msra.mxu1 %v2441_v33  ;;  %v3855_v33 = vld [vmem:[#allocation35_spill] sm:$0xff] }
 0x327   :  { %1185 = vmatprep.subr.mxu0 %v2446_v34  ;;  %1256 = vmatprep.subr.mxu1 %v2451_v35 }
 0x328   :  { %1186 = vmatpush1.msra.mxu0 %v2460_v36  ;;  %1257 = vmatpush1.msra.mxu1 %v2465_v37 }
 0x329   :  { %1187 = vmatprep.subr.mxu0 %v2477_v39  ;;  %1258 = vmatprep.subr.mxu1 %v2482_v40  ;;  %v3856_v39 = vld [vmem:[#allocation37_spill] sm:$0xff] }
 0x32a   :  { %1188 = vmatpush1.msra.mxu0 %v2489_v41  ;;  %1259 = vmatpush1.msra.mxu1 %v2494_v42  ;;  %v3857_v41 = vld [vmem:[#allocation36_spill] sm:$0xff] }
 0x32b   :  { %1189 = vmatprep.subr.mxu0 %v2499_v43  ;;  %1260 = vmatprep.subr.mxu1 %v2504_v44 }
 0x32c   :  { %1190 = vmatpush1.msra.mxu0 %v2513_v45  ;;  %1261 = vmatpush1.msra.mxu1 %v2518_v46  ;;  %v3858_v45 = vld [vmem:[#allocation38_spill] sm:$0xff] }
 0x32d   :  { %1191 = vmatprep.subr.mxu0 %v2530_v48  ;;  %1262 = vmatprep.subr.mxu1 %v2535_v49 }
 0x32e   :  { %1192 = vmatpush1.msra.mxu0 %v2542_v50  ;;  %1263 = vmatpush1.msra.mxu1 %v2547_v51 }
 0x32f   :  { %1193 = vmatprep.subr.mxu0 %v3800_v47  ;;  %1264 = vmatprep.subr.mxu1 %v3827_v5 }
 0x330   :  { %1194 = vmatpush1.msra.mxu0 %v3828_v6  ;;  %1265 = vmatpush1.msra.mxu1 %v3829_v7 }
 0x331   :  { %1195 = vmatprep.subr.mxu0 %v3830_v8  ;;  %1266 = vmatprep.subr.mxu1 %v3831_v9 }
 0x332   :  { %1196 = vmatpush1.msra.mxu0 %v3832_v10  ;;  %1267 = vmatpush1.msra.mxu1 %v3833_v12 }
 0x333   :  { %1197 = vmatprep.subr.mxu0 %v3834_v13  ;;  %1268 = vmatprep.subr.mxu1 %v3835_v14 }
 0x334   :  { %1198 = vmatpush1.msra.mxu0 %v3836_v15  ;;  %1269 = vmatpush1.msra.mxu1 %v3837_v16 }
 0x335   :  { %1199 = vmatprep.subr.mxu0 %v3838_v17  ;;  %1270 = vmatprep.subr.mxu1 %v3839_v18  ;;  %v3859_v17 = vld [vmem:[#allocation6_spill] sm:$0xff]  ;;  %v3860_v18 = vld [vmem:[#allocation27_spill] sm:$0xff] }
 0x336   :  { %1200 = vmatpush1.msra.mxu0 %v3840_v19  ;;  %1271 = vmatpush1.msra.mxu1 %v3841_v21  ;;  %v3244_v19 = vld [vmem:[%s3648_s2 + $0x120] sm:$0xff]  ;;  %v3250_v21 = vld [vmem:[%s3648_s2 + $0x130] sm:$0xff] }
 0x337   :  { %1201 = vmatprep.subr.mxu0 %v3842_v22  ;;  %1272 = vmatprep.subr.mxu1 %v3843_v23  ;;  %v3256_v22 = vld [vmem:[%s3648_s2 + $0x108] sm:$0xff]  ;;  %v3262_v23 = vld [vmem:[%s3648_s2 + $0x118] sm:$0xff] }
 0x338   :  { %1202 = vmatpush1.msra.mxu0 %v3844_v24  ;;  %1235 = vmatprep.mubr.f32.mxu0 %v3845_v25  ;;  %v3268_v24 = vld [vmem:[%s3648_s2 + $0x100] sm:$0xff] }
 0x339   :  { %1273 = vmatpush1.msra.mxu1 %v3846_v26  ;;  %1306 = vmatprep.mubr.f32.mxu1 %v3845_v25  ;;  %v3274_v26 = vld [vmem:[%s3648_s2 + $0x110] sm:$0xff] }
 0x33a   :  { %1342 = vmatprep.subr.mxu0 %v3000_v27  ;;  %1413 = vmatprep.subr.mxu1 %v3006_v28 }
 0x3d9   :  { %v1066_v32 = vpop.f32.mrf.mxu0  ;;  %v1137_v35 = vpop.f32.mrf.mxu1 }
 0x3da   :  { %v1142_v34 = vadd.f32 %v1066_v32, %v3855_v33  ;;  %v1144_v42 = vadd.f32 %v1137_v35, %v3857_v41  ;;  %v3286_v32 = vld [vmem:[%s3648_s2 + $0xf8] sm:$0xff]  ;;  %v3292_v33 = vld [vmem:[%s3648_s2 + $0xe0] sm:$0xff]  ;;  %v3304_v35 = vld [vmem:[%s3648_s2 + $0xc8] sm:$0xff] }
 0x3db   :  { %v1068_v36 = vpop.f32.mrf.mxu0  ;;  %v1139_v44 = vpop.f32.mrf.mxu1  ;;  %v3334_v41 = vld [vmem:[%s3648_s2 + $0xb8] sm:$0xff] }
 0x3dc   :  { %v1146_v37 = vmul.f32 0.5, %v1142_v34  ;;  %v1143_v40 = vadd.f32 %v1068_v36, %v3856_v39  ;;  %v1145_v46 = vadd.f32 %v1139_v44, %v3858_v45  ;;  %v3298_v34 = vld [vmem:[%s3648_s2 + $0xf0] sm:$0xff]  ;;  %v3310_v36 = vld [vmem:[%s3648_s2 + $0xd8] sm:$0xff]  ;;  %v3352_v44 = vld [vmem:[%s3648_s2 + $0x88] sm:$0xff] }
 0x3dd   :  { %v3322_v39 = vld [vmem:[%s3648_s2 + $0xd0] sm:$0xff]  ;;  %v3358_v45 = vld [vmem:[%s3648_s2 + $0x98] sm:$0xff] }
 0x3de   :  { %1907 = vtanh.f32 %v1146_v37  ;;  %v1150_v43 = vmul.f32 0.5, %v1143_v40  ;;  %v1155_v48 = vmul.f32 0.5, %v1145_v46  ;;  %v3316_v37 = vld [vmem:[%s3648_s2 + $0xc0] sm:$0xff]  ;;  %v3328_v40 = vld [vmem:[%s3648_s2 + $0xa8] sm:$0xff]  ;;  %3861 = vst [vmem:[#allocation29_spill] sm:$0xff] %v3358_v45 }
 0x3df   :  { %v3364_v46 = vld [vmem:[%s3648_s2 + $0x80] sm:$0xff] }
 0x3e0   :  { %1909 = vtanh.f32 %v1150_v43  ;;  %v3346_v43 = vld [vmem:[%s3648_s2 + $0xb0] sm:$0xff]  ;;  %3862 = vst [vmem:[#allocation28_spill] sm:$0xff] %v3364_v46 }
 0x3e1   :  { %1911 = vtanh.f32 %v1144_v42  ;;  %v3340_v42 = vld [vmem:[%s3648_s2 + $0xa0] sm:$0xff] }
 0x3e2   :  { %1913 = vtanh.f32 %v1155_v48  ;;  %v3370_v48 = vld [vmem:[%s3648_s2 + $0x90] sm:$0xff] }
 0x3e3   :  { %3863 = vst [vmem:[#allocation30_spill] sm:$0xff] %v3370_v48 }
 0x3eb   :  { %v1908_v49 = vpop.eup %1907 }
 0x3ec   :  { %v1148_v50 = vmul.f32 0.5, %v1908_v49  ;;  %v3376_v49 = vld [vmem:[%s3648_s2 + $0x68] sm:$0xff] }
 0x3ed   :  { %v1910_v51 = vpop.eup %1909  ;;  %3864 = vst [vmem:[#allocation8_spill] sm:$0xff] %v3376_v49 }
 0x3ee   :  { %v1149_v47 = vadd.f32 0.5, %v1148_v50  ;;  %v1152_v5 = vmul.f32 0.5, %v1910_v51  ;;  %v1912_v6 = vpop.eup %1911  ;;  %v3382_v50 = vld [vmem:[%s3648_s2 + $0x78] sm:$0xff]  ;;  %v3388_v51 = vld [vmem:[%s3648_s2 + $0x60] sm:$0xff] }
 0x3ef   :  { %v1914_v12 = vpop.eup %1913  ;;  %3865 = vst [vmem:[#allocation9_spill] sm:$0xff] %v3382_v50  ;;  %3866 = vst [vmem:[#allocation10_spill] sm:$0xff] %v3388_v51 }
 0x3f0   :  { %v1153_v7 = vadd.f32 0.5, %v1152_v5  ;;  %v1160_v8 = vmul.f32 %v1912_v6, %v1149_v47  ;;  %v1157_v13 = vmul.f32 0.5, %v1914_v12  ;;  %v3394_v47 = vld [vmem:[%s3648_s2 + $0x70] sm:$0xff]  ;;  %v3400_v5 = vld [vmem:[%s3648_s2 + $0x48] sm:$0xff]  ;;  %v3406_v6 = vld [vmem:[%s3648_s2 + $0x58] sm:$0xff] }
 0x3f1   :  { %3867 = vst [vmem:[#allocation11_spill] sm:$0xff] %v3394_v47  ;;  %3868 = vst [vmem:[#allocation12_spill] sm:$0xff] %v3400_v5  ;;  %v3430_v12 = vld [vmem:[%s3648_s2 + $0x38] sm:$0xff] }
 0x3f2   :  { %v1159_v9 = vmul.f32 %v1153_v7, %v3014_v57  ;;  %v1158_v14 = vadd.f32 0.5, %v1157_v13  ;;  %v3280_v57 = vld [vmem:[%s3648_s2 + $0xe8] sm:$0xff]  ;;  %3869 = vst [vmem:[#allocation13_spill] sm:$0xff] %v3406_v6  ;;  %v3412_v7 = vld [vmem:[%s3648_s2 + $0x40] sm:$0xff]  ;;  %3873 = vst [vmem:[#allocation17_spill] sm:$0xff] %v3430_v12 }
 0x3f3   :  { %3870 = vst [vmem:[#allocation14_spill] sm:$0xff] %v3412_v7  ;;  %v3436_v13 = vld [vmem:[%s3648_s2 + $0x20] sm:$0xff] }
 0x3f4   :  { %v3211_v10 = vadd.f32 %v1160_v8, %v1159_v9  ;;  %v3418_v8 = vld [vmem:[%s3648_s2 + $0x50] sm:$0xff]  ;;  %v3424_v9 = vld [vmem:[%s3648_s2 + $0x28] sm:$0xff]  ;;  %3874 = vst [vmem:[#allocation18_spill] sm:$0xff] %v3436_v13 }
 0x3f5   :  { %3871 = vst [vmem:[#allocation15_spill] sm:$0xff] %v3418_v8  ;;  %3872 = vst [vmem:[#allocation16_spill] sm:$0xff] %v3424_v9 }
 0x3f6   :  { %1915 = vtanh.f32 %v3211_v10 }
 0x403   :  { %v1916_v15 = vpop.eup %1915 }
 0x404   :  { %v1163_v16 = vmul.f32 %v1916_v15, %v1158_v14  ;;  %v3442_v14 = vld [vmem:[%s3648_s2 + $0x30] sm:$0xff]  ;;  %v3448_v15 = vld [vmem:[%s3648_s2 + $0x8] sm:$0xff] }
 0x405   :  { %3875 = vst [vmem:[#allocation19_spill] sm:$0xff] %v3442_v14  ;;  %3876 = vst [vmem:[#allocation20_spill] sm:$0xff] %v3448_v15 }
 0x406   :  { %1871 = vst [vmem:[%s3652_s6 + $0x18] sm:$0xff] %v1163_v16  ;;  %1236 = vmatmul.mubr.f32.vlgmr.msra.gmra.mxu0 %v1163_v16  ;;  %1307 = vmatmul.mubr.f32.vlgmr.msra.gmra.mxu1 %v1163_v16  ;;  %v3454_v16 = vld [vmem:[%s3648_s2 + $0x18] sm:$0xff] }
 0x407   :  { %1343 = vmatpush1.msra.mxu0 %v3023_v1  ;;  %1414 = vmatpush1.msra.mxu1 %v3029_v56  ;;  %3877 = vst [vmem:[#allocation21_spill] sm:$0xff] %v3454_v16 }
 0x408   :  { %1344 = vmatprep.subr.mxu0 %v3035_v55  ;;  %1415 = vmatprep.subr.mxu1 %v3041_v29 }
 0x409   :  { %1345 = vmatpush1.msra.mxu0 %v3047_v59  ;;  %1416 = vmatpush1.msra.mxu1 %v3053_v38 }
 0x40a   :  { %1346 = vmatprep.subr.mxu0 %v3059_v54  ;;  %1417 = vmatprep.subr.mxu1 %v3065_v11 }
 0x40b   :  { %1347 = vmatpush1.msra.mxu0 %v3071_v4  ;;  %1418 = vmatpush1.msra.mxu1 %v3077_v52 }
 0x40c   :  { %1348 = vmatprep.subr.mxu0 %v3083_v0  ;;  %1419 = vmatprep.subr.mxu1 %v3089_v58 }
 0x40d   :  { %1349 = vmatpush1.msra.mxu0 %v3095_v53  ;;  %1420 = vmatpush1.msra.mxu1 %v3101_v62 }
 0x40e   :  { %1350 = vmatprep.subr.mxu0 %v3107_v61  ;;  %1421 = vmatprep.subr.mxu1 %v3113_v30 }
 0x40f   :  { %1351 = vmatpush1.msra.mxu0 %v3119_v31  ;;  %1422 = vmatpush1.msra.mxu1 %v3125_v3 }
 0x410   :  { %1352 = vmatprep.subr.mxu0 %v3859_v17  ;;  %1423 = vmatprep.subr.mxu1 %v3860_v18 }
 0x411   :  { %1353 = vmatpush1.msra.mxu0 %v3143_v20  ;;  %1424 = vmatpush1.msra.mxu1 %v3149_v60 }
 0x412   :  { %1354 = vmatprep.subr.mxu0 %v3155_v2  ;;  %1425 = vmatprep.subr.mxu1 %v3161_v63 }
 0x413   :  { %1355 = vmatpush1.msra.mxu0 %v3244_v19  ;;  %1426 = vmatpush1.msra.mxu1 %v3250_v21 }
 0x414   :  { %1356 = vmatprep.subr.mxu0 %v3256_v22  ;;  %1427 = vmatprep.subr.mxu1 %v3262_v23 }
 0x415   :  { %1357 = vmatpush1.msra.mxu0 %v3268_v24  ;;  %1428 = vmatpush1.msra.mxu1 %v3274_v26 }
 0x416   :  { %1358 = vmatprep.subr.mxu0 %v3280_v57  ;;  %1429 = vmatprep.subr.mxu1 %v3286_v32 }
 0x417   :  { %1359 = vmatpush1.msra.mxu0 %v3292_v33  ;;  %1430 = vmatpush1.msra.mxu1 %v3298_v34 }
 0x418   :  { %1360 = vmatprep.subr.mxu0 %v3304_v35  ;;  %1431 = vmatprep.subr.mxu1 %v3310_v36 }
 0x419   :  { %1361 = vmatpush1.msra.mxu0 %v3316_v37  ;;  %1432 = vmatpush1.msra.mxu1 %v3322_v39 }
 0x41a   :  { %1362 = vmatprep.subr.mxu0 %v3328_v40  ;;  %1433 = vmatprep.subr.mxu1 %v3334_v41 }
 0x41b   :  { %1363 = vmatpush1.msra.mxu0 %v3340_v42  ;;  %1434 = vmatpush1.msra.mxu1 %v3346_v43 }
 0x41c   :  { %1364 = vmatprep.subr.mxu0 %v3352_v44  ;;  %1435 = vmatprep.subr.mxu1 %v3358_v45 }
 0x41d   :  { %1365 = vmatpush1.msra.mxu0 %v3364_v46  ;;  %1436 = vmatpush1.msra.mxu1 %v3370_v48 }
 0x41e   :  { %1366 = vmatprep.subr.mxu0 %v3376_v49  ;;  %1437 = vmatprep.subr.mxu1 %v3382_v50 }
 0x41f   :  { %1367 = vmatpush1.msra.mxu0 %v3388_v51  ;;  %1438 = vmatpush1.msra.mxu1 %v3394_v47 }
 0x420   :  { %1368 = vmatprep.subr.mxu0 %v3400_v5  ;;  %1439 = vmatprep.subr.mxu1 %v3406_v6  ;;  %v3882_v5 = vld [vmem:[#allocation40_spill] sm:$0xff] }
 0x421   :  { %1369 = vmatpush1.msra.mxu0 %v3412_v7  ;;  %1440 = vmatpush1.msra.mxu1 %v3418_v8  ;;  %v3881_v7 = vld [vmem:[#allocation41_spill] sm:$0xff] }
 0x422   :  { %1370 = vmatprep.subr.mxu0 %v3424_v9  ;;  %1441 = vmatprep.subr.mxu1 %v3430_v12 }
 0x423   :  { %1371 = vmatpush1.msra.mxu0 %v3436_v13  ;;  %1442 = vmatpush1.msra.mxu1 %v3442_v14  ;;  %v3460_v13 = vld [vmem:[%s3648_s2] sm:$0xff]  ;;  %v3880_v14 = vld [vmem:[#allocation39_spill] sm:$0xff] }
 0x424   :  { %1372 = vmatprep.subr.mxu0 %v3448_v15  ;;  %1443 = vmatprep.subr.mxu1 %v3454_v16  ;;  %3878 = vst [vmem:[#allocation22_spill] sm:$0xff] %v3460_v13  ;;  %v3467_v15 = vld [vmem:[%s3648_s2 + $0x10] sm:$0xff] }
 0x425   :  { %1373 = vmatpush1.msra.mxu0 %v3460_v13  ;;  %1406 = vmatprep.mubr.f32.mxu0 %v3845_v25  ;;  %3879 = vst [vmem:[#allocation23_spill] sm:$0xff] %v3467_v15 }
 0x426   :  { %1444 = vmatpush1.msra.mxu1 %v3467_v15  ;;  %1477 = vmatprep.mubr.f32.mxu1 %v3845_v25  ;;  %v3883_v25 = vld [vmem:[#allocation42_spill] sm:$0xff] }
 0x427   :  { %1513 = vmatprep.subr.mxu0 %v3000_v27  ;;  %1584 = vmatprep.subr.mxu1 %v3006_v28 }
 0x4c6   :  { %v1237_v16 = vpop.f32.mrf.mxu0  ;;  %v1308_v9 = vpop.f32.mrf.mxu1 }
 0x4c7   :  { %v1313_v12 = vadd.f32 %v1237_v16, %v3880_v14  ;;  %v1315_v47 = vadd.f32 %v1308_v9, %v3882_v5  ;;  %v3892_v9 = vld [vmem:[#allocation13_spill] sm:$0xff] }
 0x4c8   :  { %v1239_v13 = vpop.f32.mrf.mxu0  ;;  %v1310_v15 = vpop.f32.mrf.mxu1 }
 0x4c9   :  { %v1317_v8 = vmul.f32 0.5, %v1313_v12  ;;  %v1314_v6 = vadd.f32 %v1239_v13, %v3881_v7  ;;  %v1316_v50 = vadd.f32 %v1310_v15, %v3883_v25  ;;  %v3893_v13 = vld [vmem:[#allocation14_spill] sm:$0xff]  ;;  %v3894_v15 = vld [vmem:[#allocation15_spill] sm:$0xff] }
 0x4cb   :  { %1917 = vtanh.f32 %v1317_v8  ;;  %v1321_v51 = vmul.f32 0.5, %v1314_v6  ;;  %v1326_v27 = vmul.f32 0.5, %v1316_v50  ;;  %v3891_v6 = vld [vmem:[#allocation12_spill] sm:$0xff] }
 0x4cd   :  { %1919 = vtanh.f32 %v1321_v51 }
 0x4ce   :  { %1921 = vtanh.f32 %v1315_v47 }
 0x4cf   :  { %1923 = vtanh.f32 %v1326_v27  ;;  %v3884_v27 = vld [vmem:[#allocation29_spill] sm:$0xff] }
 0x4d8   :  { %v1918_v49 = vpop.eup %1917 }
 0x4d9   :  { %v1319_v28 = vmul.f32 0.5, %v1918_v49  ;;  %v3890_v49 = vld [vmem:[#allocation11_spill] sm:$0xff] }
 0x4da   :  { %v1920_v48 = vpop.eup %1919 }
 0x4db   :  { %v1320_v46 = vadd.f32 0.5, %v1319_v28  ;;  %v1323_v14 = vmul.f32 0.5, %v1920_v48  ;;  %v1922_v16 = vpop.eup %1921  ;;  %v3885_v28 = vld [vmem:[#allocation28_spill] sm:$0xff]  ;;  %v3889_v48 = vld [vmem:[#allocation10_spill] sm:$0xff] }
 0x4dc   :  { %v1924_v51 = vpop.eup %1923 }
 0x4dd   :  { %v1324_v12 = vadd.f32 0.5, %v1323_v14  ;;  %v1331_v45 = vmul.f32 %v1922_v16, %v1320_v46  ;;  %v1328_v47 = vmul.f32 0.5, %v1924_v51  ;;  %v3888_v46 = vld [vmem:[#allocation9_spill] sm:$0xff]  ;;  %v3895_v14 = vld [vmem:[#allocation16_spill] sm:$0xff] }
 0x4de   :  { %v3896_v16 = vld [vmem:[#allocation17_spill] sm:$0xff]  ;;  %v3899_v51 = vld [vmem:[#allocation20_spill] sm:$0xff] }
 0x4df   :  { %v1330_v7 = vmul.f32 %v1324_v12, %v3211_v10  ;;  %v1329_v5 = vadd.f32 0.5, %v1328_v47  ;;  %v3886_v10 = vld [vmem:[#allocation30_spill] sm:$0xff]  ;;  %v3900_v47 = vld [vmem:[#allocation21_spill] sm:$0xff] }
 0x4e0   :  { %v3897_v12 = vld [vmem:[#allocation18_spill] sm:$0xff] }
 0x4e1   :  { %v3478_v8 = vadd.f32 %v1331_v45, %v1330_v7  ;;  %v3887_v45 = vld [vmem:[#allocation8_spill] sm:$0xff]  ;;  %v3898_v7 = vld [vmem:[#allocation19_spill] sm:$0xff] }
 0x4e3   :  { %1925 = vtanh.f32 %v3478_v8 }
 0x4f0   :  { %v1926_v25 = vpop.eup %1925 }
 0x4f1   :  { %v1334_v50 = vmul.f32 %v1926_v25, %v1329_v5  ;;  %v3901_v5 = vld [vmem:[#allocation22_spill] sm:$0xff]  ;;  %v3902_v25 = vmov 0.0  }
 0x4f3   :  { %1872 = vst [vmem:[%s3652_s6 + $0x20] sm:$0xff] %v1334_v50  ;;  %1407 = vmatmul.mubr.f32.vlgmr.msra.gmra.mxu0 %v1334_v50  ;;  %1478 = vmatmul.mubr.f32.vlgmr.msra.gmra.mxu1 %v1334_v50  ;;  %v3903_v50 = vld [vmem:[#allocation23_spill] sm:$0xff] }
 0x4f4   :  { %1514 = vmatpush1.msra.mxu0 %v3023_v1  ;;  %1585 = vmatpush1.msra.mxu1 %v3029_v56 }
 0x4f5   :  { %1515 = vmatprep.subr.mxu0 %v3035_v55  ;;  %1586 = vmatprep.subr.mxu1 %v3041_v29 }
 0x4f6   :  { %1516 = vmatpush1.msra.mxu0 %v3047_v59  ;;  %1587 = vmatpush1.msra.mxu1 %v3053_v38 }
 0x4f7   :  { %1517 = vmatprep.subr.mxu0 %v3059_v54  ;;  %1588 = vmatprep.subr.mxu1 %v3065_v11 }
 0x4f8   :  { %1518 = vmatpush1.msra.mxu0 %v3071_v4  ;;  %1589 = vmatpush1.msra.mxu1 %v3077_v52 }
 0x4f9   :  { %1519 = vmatprep.subr.mxu0 %v3083_v0  ;;  %1590 = vmatprep.subr.mxu1 %v3089_v58 }
 0x4fa   :  { %1520 = vmatpush1.msra.mxu0 %v3095_v53  ;;  %1591 = vmatpush1.msra.mxu1 %v3101_v62 }
 0x4fb   :  { %1521 = vmatprep.subr.mxu0 %v3107_v61  ;;  %1592 = vmatprep.subr.mxu1 %v3113_v30 }
 0x4fc   :  { %1522 = vmatpush1.msra.mxu0 %v3119_v31  ;;  %1593 = vmatpush1.msra.mxu1 %v3125_v3 }
 0x4fd   :  { %1523 = vmatprep.subr.mxu0 %v3859_v17  ;;  %1594 = vmatprep.subr.mxu1 %v3860_v18 }
 0x4fe   :  { %1524 = vmatpush1.msra.mxu0 %v3143_v20  ;;  %1595 = vmatpush1.msra.mxu1 %v3149_v60 }
 0x4ff   :  { %1525 = vmatprep.subr.mxu0 %v3155_v2  ;;  %1596 = vmatprep.subr.mxu1 %v3161_v63 }
 0x500   :  { %1526 = vmatpush1.msra.mxu0 %v3244_v19  ;;  %1597 = vmatpush1.msra.mxu1 %v3250_v21 }
 0x501   :  { %1527 = vmatprep.subr.mxu0 %v3256_v22  ;;  %1598 = vmatprep.subr.mxu1 %v3262_v23 }
 0x502   :  { %1528 = vmatpush1.msra.mxu0 %v3268_v24  ;;  %1599 = vmatpush1.msra.mxu1 %v3274_v26 }
 0x503   :  { %1529 = vmatprep.subr.mxu0 %v3280_v57  ;;  %1600 = vmatprep.subr.mxu1 %v3286_v32 }
 0x504   :  { %1530 = vmatpush1.msra.mxu0 %v3292_v33  ;;  %1601 = vmatpush1.msra.mxu1 %v3298_v34 }
 0x505   :  { %1531 = vmatprep.subr.mxu0 %v3304_v35  ;;  %1602 = vmatprep.subr.mxu1 %v3310_v36 }
 0x506   :  { %1532 = vmatpush1.msra.mxu0 %v3316_v37  ;;  %1603 = vmatpush1.msra.mxu1 %v3322_v39 }
 0x507   :  { %1533 = vmatprep.subr.mxu0 %v3328_v40  ;;  %1604 = vmatprep.subr.mxu1 %v3334_v41 }
 0x508   :  { %1534 = vmatpush1.msra.mxu0 %v3340_v42  ;;  %1605 = vmatpush1.msra.mxu1 %v3346_v43 }
 0x509   :  { %1535 = vmatprep.subr.mxu0 %v3352_v44  ;;  %1606 = vmatprep.subr.mxu1 %v3884_v27 }
 0x50a   :  { %1536 = vmatpush1.msra.mxu0 %v3885_v28  ;;  %1607 = vmatpush1.msra.mxu1 %v3886_v10 }
 0x50b   :  { %1537 = vmatprep.subr.mxu0 %v3887_v45  ;;  %1608 = vmatprep.subr.mxu1 %v3888_v46 }
 0x50c   :  { %1538 = vmatpush1.msra.mxu0 %v3889_v48  ;;  %1609 = vmatpush1.msra.mxu1 %v3890_v49 }
 0x50d   :  { %1539 = vmatprep.subr.mxu0 %v3891_v6  ;;  %1610 = vmatprep.subr.mxu1 %v3892_v9  ;;  %v3907_v6 = vld [vmem:[#allocation45_spill] sm:$0xff] }
 0x50e   :  { %1540 = vmatpush1.msra.mxu0 %v3893_v13  ;;  %1611 = vmatpush1.msra.mxu1 %v3894_v15  ;;  %v3904_v15 = vld [vmem:[#allocation7_spill] sm:$0xff] }
 0x50f   :  { %1541 = vmatprep.subr.mxu0 %v3895_v14  ;;  %1612 = vmatprep.subr.mxu1 %v3896_v16  ;;  %v3905_v14 = vld [vmem:[#allocation5_spill] sm:$0xff] }
 0x510   :  { %1542 = vmatpush1.msra.mxu0 %v3897_v12  ;;  %1613 = vmatpush1.msra.mxu1 %v3898_v7  ;;  %v3906_v12 = vld [vmem:[#allocation43_spill] sm:$0xff] }
 0x511   :  { %1543 = vmatprep.subr.mxu0 %v3899_v51  ;;  %1614 = vmatprep.subr.mxu1 %v3900_v47 }
 0x512   :  { %1544 = vmatpush1.msra.mxu0 %v3901_v5  ;;  %1577 = vmatprep.mubr.f32.mxu0 %v3902_v25  ;;  %v3908_v5 = vld [vmem:[#allocation44_spill] sm:$0xff] }
 0x513   :  { %1615 = vmatpush1.msra.mxu1 %v3903_v50  ;;  %1648 = vmatprep.mubr.f32.mxu1 %v3902_v25  ;;  %v3909_v25 = vld [vmem:[#allocation46_spill] sm:$0xff] }
 0x514   :  { %1684 = vmatprep.subr.mxu0 %v3904_v15  ;;  %1755 = vmatprep.subr.mxu1 %v3905_v14 }
 0x5b3   :  { %v1408_v16 = vpop.f32.mrf.mxu0  ;;  %v1479_v7 = vpop.f32.mrf.mxu1 }
 0x5b4   :  { %v1484_v13 = vadd.f32 %v1408_v16, %v3906_v12  ;;  %v1486_v49 = vadd.f32 %v1479_v7, %v3908_v5 }
 0x5b5   :  { %v1410_v9 = vpop.f32.mrf.mxu0  ;;  %v1481_v50 = vpop.f32.mrf.mxu1 }
 0x5b6   :  { %v1488_v51 = vmul.f32 0.5, %v1484_v13  ;;  %v1485_v47 = vadd.f32 %v1410_v9, %v3907_v6  ;;  %v1487_v46 = vadd.f32 %v1481_v50, %v3909_v25  ;;  %v3934_v50 = vld [vmem:[#allocation51_spill] sm:$0xff] }
 0x5b8   :  { %1927 = vtanh.f32 %v1488_v51  ;;  %v1492_v48 = vmul.f32 0.5, %v1485_v47  ;;  %v1497_v15 = vmul.f32 0.5, %v1487_v46 }
 0x5ba   :  { %1929 = vtanh.f32 %v1492_v48 }
 0x5bb   :  { %1931 = vtanh.f32 %v1486_v49 }
 0x5bc   :  { %1933 = vtanh.f32 %v1497_v15 }
 0x5c5   :  { %v1928_v45 = vpop.eup %1927 }
 0x5c6   :  { %v1490_v14 = vmul.f32 0.5, %v1928_v45 }
 0x5c7   :  { %v1930_v10 = vpop.eup %1929 }
 0x5c8   :  { %v1491_v28 = vadd.f32 0.5, %v1490_v14  ;;  %v1494_v16 = vmul.f32 0.5, %v1930_v10  ;;  %v1932_v12 = vpop.eup %1931 }
 0x5c9   :  { %v1934_v48 = vpop.eup %1933 }
 0x5ca   :  { %v1495_v13 = vadd.f32 0.5, %v1494_v16  ;;  %v1502_v27 = vmul.f32 %v1932_v12, %v1491_v28  ;;  %v1499_v49 = vmul.f32 0.5, %v1934_v48 }
 0x5cc   :  { %v1501_v6 = vmul.f32 %v1495_v13, %v3478_v8  ;;  %v1500_v7 = vadd.f32 0.5, %v1499_v49  ;;  %v3935_v13 = vld [vmem:[#allocation53_spill] sm:$0xff] }
 0x5ce   :  { %v3555_v9 = vadd.f32 %v1502_v27, %v1501_v6 }
 0x5d0   :  { %1935 = vtanh.f32 %v3555_v9 }
 0x5dd   :  { %v1936_v51 = vpop.eup %1935 }
 0x5de   :  { %v1505_v46 = vmul.f32 %v1936_v51, %v1500_v7  ;;  %v3937_v51 = vld [vmem:[#allocation54_spill] sm:$0xff] }
 0x5e0   :  { %1873 = vst [vmem:[%s3652_s6 + $0x28] sm:$0xff] %v1505_v46  ;;  %1578 = vmatmul.mubr.f32.vlgmr.msra.gmra.mxu0 %v1505_v46  ;;  %1649 = vmatmul.mubr.f32.vlgmr.msra.gmra.mxu1 %v1505_v46 }
 0x5e1   :  { %1685 = vmatpush1.msra.mxu0 %v3023_v1  ;;  %1756 = vmatpush1.msra.mxu1 %v3029_v56  ;;  %v3910_v1 = vld [vmem:[#allocation29_spill] sm:$0xff]  ;;  %v3911_v56 = vld [vmem:[#allocation28_spill] sm:$0xff] }
 0x5e2   :  { %1686 = vmatprep.subr.mxu0 %v3035_v55  ;;  %1757 = vmatprep.subr.mxu1 %v3041_v29  ;;  %v3912_v55 = vld [vmem:[#allocation30_spill] sm:$0xff]  ;;  %v3913_v29 = vld [vmem:[#allocation8_spill] sm:$0xff] }
 0x5e3   :  { %1687 = vmatpush1.msra.mxu0 %v3047_v59  ;;  %1758 = vmatpush1.msra.mxu1 %v3053_v38  ;;  %v3914_v59 = vld [vmem:[#allocation9_spill] sm:$0xff]  ;;  %v3915_v38 = vld [vmem:[#allocation10_spill] sm:$0xff] }
 0x5e4   :  { %1688 = vmatprep.subr.mxu0 %v3059_v54  ;;  %1759 = vmatprep.subr.mxu1 %v3065_v11  ;;  %v3916_v54 = vld [vmem:[#allocation11_spill] sm:$0xff]  ;;  %v3917_v11 = vld [vmem:[#allocation12_spill] sm:$0xff] }
 0x5e5   :  { %1689 = vmatpush1.msra.mxu0 %v3071_v4  ;;  %1760 = vmatpush1.msra.mxu1 %v3077_v52  ;;  %v3918_v4 = vld [vmem:[#allocation13_spill] sm:$0xff]  ;;  %v3919_v52 = vld [vmem:[#allocation14_spill] sm:$0xff] }
 0x5e6   :  { %1690 = vmatprep.subr.mxu0 %v3083_v0  ;;  %1761 = vmatprep.subr.mxu1 %v3089_v58  ;;  %v3920_v0 = vld [vmem:[#allocation15_spill] sm:$0xff]  ;;  %v3921_v58 = vld [vmem:[#allocation16_spill] sm:$0xff] }
 0x5e7   :  { %1691 = vmatpush1.msra.mxu0 %v3095_v53  ;;  %1762 = vmatpush1.msra.mxu1 %v3101_v62  ;;  %v3922_v53 = vld [vmem:[#allocation17_spill] sm:$0xff]  ;;  %v3923_v62 = vld [vmem:[#allocation18_spill] sm:$0xff] }
 0x5e8   :  { %1692 = vmatprep.subr.mxu0 %v3107_v61  ;;  %1763 = vmatprep.subr.mxu1 %v3113_v30  ;;  %v3924_v61 = vld [vmem:[#allocation19_spill] sm:$0xff]  ;;  %v3925_v30 = vld [vmem:[#allocation20_spill] sm:$0xff] }
 0x5e9   :  { %1693 = vmatpush1.msra.mxu0 %v3119_v31  ;;  %1764 = vmatpush1.msra.mxu1 %v3125_v3  ;;  %v3926_v31 = vld [vmem:[#allocation21_spill] sm:$0xff]  ;;  %v3927_v3 = vld [vmem:[#allocation22_spill] sm:$0xff] }
 0x5ea   :  { %1694 = vmatprep.subr.mxu0 %v3859_v17  ;;  %1765 = vmatprep.subr.mxu1 %v3860_v18 }
 0x5eb   :  { %1695 = vmatpush1.msra.mxu0 %v3143_v20  ;;  %1766 = vmatpush1.msra.mxu1 %v3149_v60  ;;  %v3930_v60 = vld [vmem:[#allocation47_spill] sm:$0xff] }
 0x5ec   :  { %1696 = vmatprep.subr.mxu0 %v3155_v2  ;;  %1767 = vmatprep.subr.mxu1 %v3161_v63  ;;  %v3928_v2 = vmov 0.0   ;;  %v3929_v63 = vld [vmem:[#allocation23_spill] sm:$0xff] }
 0x5ed   :  { %1697 = vmatpush1.msra.mxu0 %v3244_v19  ;;  %1768 = vmatpush1.msra.mxu1 %v3250_v21 }
 0x5ee   :  { %1698 = vmatprep.subr.mxu0 %v3256_v22  ;;  %1769 = vmatprep.subr.mxu1 %v3262_v23  ;;  %v3931_v22 = vld [vmem:[#allocation49_spill] sm:$0xff] }
 0x5ef   :  { %1699 = vmatpush1.msra.mxu0 %v3268_v24  ;;  %1770 = vmatpush1.msra.mxu1 %v3274_v26  ;;  %v3932_v24 = vld [vmem:[#allocation48_spill] sm:$0xff] }
 0x5f0   :  { %1700 = vmatprep.subr.mxu0 %v3280_v57  ;;  %1771 = vmatprep.subr.mxu1 %v3286_v32 }
 0x5f1   :  { %1701 = vmatpush1.msra.mxu0 %v3292_v33  ;;  %1772 = vmatpush1.msra.mxu1 %v3298_v34  ;;  %v3933_v33 = vld [vmem:[#allocation50_spill] sm:$0xff] }
 0x5f2   :  { %1702 = vmatprep.subr.mxu0 %v3304_v35  ;;  %1773 = vmatprep.subr.mxu1 %v3310_v36 }
 0x5f3   :  { %1703 = vmatpush1.msra.mxu0 %v3316_v37  ;;  %1774 = vmatpush1.msra.mxu1 %v3322_v39 }
 0x5f4   :  { %1704 = vmatprep.subr.mxu0 %v3328_v40  ;;  %1775 = vmatprep.subr.mxu1 %v3334_v41 }
 0x5f5   :  { %1705 = vmatpush1.msra.mxu0 %v3340_v42  ;;  %1776 = vmatpush1.msra.mxu1 %v3346_v43 }
 0x5f6   :  { %1706 = vmatprep.subr.mxu0 %v3352_v44  ;;  %1777 = vmatprep.subr.mxu1 %v3910_v1 }
 0x5f7   :  { %1707 = vmatpush1.msra.mxu0 %v3911_v56  ;;  %1778 = vmatpush1.msra.mxu1 %v3912_v55 }
 0x5f8   :  { %1708 = vmatprep.subr.mxu0 %v3913_v29  ;;  %1779 = vmatprep.subr.mxu1 %v3914_v59 }
 0x5f9   :  { %1709 = vmatpush1.msra.mxu0 %v3915_v38  ;;  %1780 = vmatpush1.msra.mxu1 %v3916_v54 }
 0x5fa   :  { %1710 = vmatprep.subr.mxu0 %v3917_v11  ;;  %1781 = vmatprep.subr.mxu1 %v3918_v4 }
 0x5fb   :  { %1711 = vmatpush1.msra.mxu0 %v3919_v52  ;;  %1782 = vmatpush1.msra.mxu1 %v3920_v0 }
 0x5fc   :  { %1712 = vmatprep.subr.mxu0 %v3921_v58  ;;  %1783 = vmatprep.subr.mxu1 %v3922_v53 }
 0x5fd   :  { %1713 = vmatpush1.msra.mxu0 %v3923_v62  ;;  %1784 = vmatpush1.msra.mxu1 %v3924_v61 }
 0x5fe   :  { %1714 = vmatprep.subr.mxu0 %v3925_v30  ;;  %1785 = vmatprep.subr.mxu1 %v3926_v31 }
 0x5ff   :  { %1715 = vmatpush1.msra.mxu0 %v3927_v3  ;;  %1748 = vmatprep.mubr.f32.mxu0 %v3928_v2 }
 0x600   :  { %1786 = vmatpush1.msra.mxu1 %v3929_v63  ;;  %1819 = vmatprep.mubr.f32.mxu1 %v3928_v2 }
 0x6a0   :  { %v1579_v20 = vpop.f32.mrf.mxu0  ;;  %v1650_v18 = vpop.f32.mrf.mxu1 }
 0x6a1   :  { %v1655_v17 = vadd.f32 %v1579_v20, %v3930_v60  ;;  %v1657_v26 = vadd.f32 %v1650_v18, %v3932_v24 }
 0x6a2   :  { %v1581_v19 = vpop.f32.mrf.mxu0  ;;  %v1652_v32 = vpop.f32.mrf.mxu1 }
 0x6a3   :  { %v1659_v21 = vmul.f32 0.5, %v1655_v17  ;;  %v1656_v23 = vadd.f32 %v1581_v19, %v3931_v22  ;;  %v1658_v34 = vadd.f32 %v1652_v32, %v3933_v33 }
 0x6a5   :  { %1937 = vtanh.f32 %v1659_v21  ;;  %v1663_v57 = vmul.f32 0.5, %v1656_v23  ;;  %v1668_v35 = vmul.f32 0.5, %v1658_v34 }
 0x6a7   :  { %1939 = vtanh.f32 %v1663_v57 }
 0x6a8   :  { %1941 = vtanh.f32 %v1657_v26 }
 0x6a9   :  { %1943 = vtanh.f32 %v1668_v35 }
 0x6b2   :  { %v1938_v36 = vpop.eup %1937 }
 0x6b3   :  { %v1661_v37 = vmul.f32 0.5, %v1938_v36 }
 0x6b4   :  { %v1940_v39 = vpop.eup %1939 }
 0x6b5   :  { %v1662_v40 = vadd.f32 0.5, %v1661_v37  ;;  %v1665_v41 = vmul.f32 0.5, %v1940_v39  ;;  %v1942_v42 = vpop.eup %1941 }
 0x6b6   :  { %v1944_v28 = vpop.eup %1943 }
 0x6b7   :  { %v1666_v43 = vadd.f32 0.5, %v1665_v41  ;;  %v1673_v44 = vmul.f32 %v1942_v42, %v1662_v40  ;;  %v1670_v10 = vmul.f32 0.5, %v1944_v28 }
 0x6b9   :  { %v1672_v8 = vmul.f32 %v1666_v43, %v3555_v9  ;;  %v1671_v45 = vadd.f32 0.5, %v1670_v10  ;;  %v3936_v9 = vld [vmem:[#allocation52_spill] sm:$0xff] }
 0x6bb   :  { %v1674_v27 = vadd.f32 %v1673_v44, %v1672_v8 }
 0x6bd   :  { %1945 = vtanh.f32 %v1674_v27 }
 0x6ca   :  { %v1946_v47 = vpop.eup %1945 }
 0x6cb   :  { %v1676_v5 = vmul.f32 %v1946_v47, %v1671_v45 }
 0x6cd   :  { %1874 = vst [vmem:[%s3652_s6 + $0x30] sm:$0xff] %v1676_v5  ;;  %1749 = vmatmul.mubr.f32.vlgmr.msra.gmra.mxu0 %v1676_v5  ;;  %1820 = vmatmul.mubr.f32.vlgmr.msra.gmra.mxu1 %v1676_v5 }
 0x78d   :  { %v1750_v25 = vpop.f32.mrf.mxu0  ;;  %v1821_v14 = vpop.f32.mrf.mxu1 }
 0x78e   :  { %v1826_v15 = vadd.f32 %v1750_v25, %v3934_v50  ;;  %v1828_v48 = vadd.f32 %v1821_v14, %v3936_v9 }
 0x78f   :  { %v1752_v16 = vpop.f32.mrf.mxu0  ;;  %v1823_v7 = vpop.f32.mrf.mxu1 }
 0x790   :  { %v1830_v12 = vmul.f32 0.5, %v1826_v15  ;;  %v1827_v6 = vadd.f32 %v1752_v16, %v3935_v13  ;;  %v1829_v46 = vadd.f32 %v1823_v7, %v3937_v51 }
 0x792   :  { %1947 = vtanh.f32 %v1830_v12  ;;  %v1834_v49 = vmul.f32 0.5, %v1827_v6  ;;  %v1839_v1 = vmul.f32 0.5, %v1829_v46 }
 0x794   :  { %1949 = vtanh.f32 %v1834_v49 }
 0x795   :  { %1951 = vtanh.f32 %v1828_v48 }
 0x796   :  { %1953 = vtanh.f32 %v1839_v1 }
 0x79f   :  { %v1948_v56 = vpop.eup %1947 }
 0x7a0   :  { %v1832_v55 = vmul.f32 0.5, %v1948_v56 }
 0x7a1   :  { %v1950_v29 = vpop.eup %1949 }
 0x7a2   :  { %v1833_v59 = vadd.f32 0.5, %v1832_v55  ;;  %v1836_v38 = vmul.f32 0.5, %v1950_v29  ;;  %v1952_v54 = vpop.eup %1951 }
 0x7a3   :  { %v1954_v58 = vpop.eup %1953 }
 0x7a4   :  { %v1837_v11 = vadd.f32 0.5, %v1836_v38  ;;  %v1844_v4 = vmul.f32 %v1952_v54, %v1833_v59  ;;  %v1841_v53 = vmul.f32 0.5, %v1954_v58 }
 0x7a6   :  { %v1843_v52 = vmul.f32 %v1837_v11, %v1674_v27  ;;  %v1842_v62 = vadd.f32 0.5, %v1841_v53 }
 0x7a8   :  { %v1845_v0 = vadd.f32 %v1844_v4, %v1843_v52 }
 0x7aa   :  { %1955 = vtanh.f32 %v1845_v0  ;;  %1854 = vst [vmem:[%s3653_s8] sm:$0xff] %v1845_v0 }
 0x7b7   :  { %v1956_v61 = vpop.eup %1955 }
 0x7b8   :  { %v1847_v30 = vmul.f32 %v1956_v61, %v1842_v62 }
 0x7ba   :  { %1875 = vst [vmem:[%s3652_s6 + $0x38] sm:$0xff] %v1847_v30  ;;  %1853 = vst [vmem:[%s3654_s7] sm:$0xff] %v1847_v30 }

</bundles_post_ra>
